<compile_context>
chip_gen: v6e
topology: v6e:2x2x1
jax: 0.10.0
libtpu: 0.0.40
codegen_flags: <defaults>
</compile_context>

<pallas_src>
import functools
import math

import jax
import jax.numpy as jnp
from jax.experimental import pallas as pl
from jax.experimental.pallas import tpu as pltpu

MATMUL_DTYPE = jnp.bfloat16   # MXU input dtype; accumulation stays float32
LN_EPS = 1e-12                # matches nn.LayerNorm(eps=1e-12)
NEG_INF = -1e30               # finite "-inf" for masked attention scores


def _layer_norm(x, g, b, eps=LN_EPS):
    mean = jnp.mean(x, axis=-1, keepdims=True)
    var = jnp.mean((x - mean) ** 2, axis=-1, keepdims=True)
    return (x - mean) * jax.lax.rsqrt(var + eps) * g + b


def _mm(a, w):
    # MXU matmul: bf16 inputs, f32 accumulation.
    return jnp.dot(a.astype(w.dtype), w, preferred_element_type=jnp.float32)


def fused_forward_kernel(h_ref,
                         ln1_g_ref, ln1_b_ref,
                         wq_ref, wk_ref, wv_ref,
                         bq_ref, bk_ref, bv_ref,
                         wo_ref, bo_ref,
                         ln2_g_ref, ln2_b_ref,
                         w1_ref, b1_ref, w2_ref, b2_ref,
                         lm_w_ref,
                         out_ref, *, seq_len, num_heads):
    """All transformer layers + tied LM head for one block of whole sequences."""
    T, D = h_ref.shape                      # T = batch_tile * seq_len token rows
    bt = T // seq_len
    H = num_heads
    hd = D // H
    L = wq_ref.shape[0]
    md = wq_ref.dtype                       # matmul (MXU) dtype

    h = h_ref[...]                          # (T, D) f32, stays in VMEM/vregs

    # Boolean causal mask built once per grid step, reused by every layer/head.
    row = jax.lax.broadcasted_iota(jnp.int32, (seq_len, seq_len), 0)
    col = jax.lax.broadcasted_iota(jnp.int32, (seq_len, seq_len), 1)
    causal = (col <= row)[None]             # (1, S, S), broadcasts over H*bt

    def to_heads(t):
        # (T, D) f32 -> (H*bt, S, hd) bf16; head-major leading batch axis so the
        # attention einsums run with a single leading batch dim of size H*bt.
        parts = [t[:, hh * hd:(hh + 1) * hd].reshape(bt, seq_len, hd)
                 for hh in range(H)]
        return jnp.concatenate(parts, axis=0).astype(md)

    def from_heads(o):
        # (H*bt, S, hd) f32 -> (T, D) f32 with head hh in columns [hh*hd:(hh+1)*hd]
        parts = [o[hh * bt:(hh + 1) * bt].reshape(T, hd) for hh in range(H)]
        return jnp.concatenate(parts, axis=-1)

    # Layers statically unrolled; all per-layer weights are VMEM-resident.
    # TODO(synk): for large L*D*hidden (weights exceeding VMEM, esp. v7x 64 MiB),
    # stream layer weights via a grid axis / emit_pipeline instead of stacking.
    for l in range(L):
        # ---- LayerNorm 1 + causal multi-head self-attention + residual ----
        hn = _layer_norm(h, ln1_g_ref[l], ln1_b_ref[l])
        hn_md = hn.astype(md)
        q = _mm(hn_md, wq_ref[l]) + bq_ref[l]     # (T, D); 1/sqrt(hd) pre-folded
        k = _mm(hn_md, wk_ref[l]) + bk_ref[l]
        v = _mm(hn_md, wv_ref[l]) + bv_ref[l]
        qh, kh, vh = to_heads(q), to_heads(k), to_heads(v)

        # TODO(synk): for long sequences, tile the KV axis with an online
        # softmax (flash pattern) instead of the full (H*bt, S, S) score tensor.
        s = jnp.einsum("bqd,bkd->bqk", qh, kh,
                       preferred_element_type=jnp.float32)   # (H*bt, S, S)
        s = jnp.where(causal, s, NEG_INF)
        s = s - jnp.max(s, axis=-1, keepdims=True)
        p = jnp.exp(s)
        # approx reciprocal runs on the EUP (free slot); tiny deviation from
        # exact f32 division -- fine for tolerance-based parity.
        p = p * pl.reciprocal(jnp.sum(p, axis=-1, keepdims=True), approx=True)
        o = jnp.einsum("bqk,bkd->bqd", p.astype(md), vh,
                       preferred_element_type=jnp.float32)   # (H*bt, S, hd)

        attn = _mm(from_heads(o), wo_ref[l]) + bo_ref[l]      # single (T,D)x(D,D)
        h = attn + hn                       # residual to LN1 output (as in ref)

        # ---- LayerNorm 2 + feed-forward + residual ----
        h2 = _layer_norm(h, ln2_g_ref[l], ln2_b_ref[l])
        ff = jnp.maximum(_mm(h2, w1_ref[l]) + b1_ref[l], 0.0)
        ff = _mm(ff, w2_ref[l]) + b2_ref[l]
        h = ff + h2                         # residual to LN2 output (as in ref)

    # ---- tied LM head: logits = h @ tok_emb^T (contract D on both operands,
    #      no transposed copy of the (V, D) embedding ever materialized). ----
    # TODO(synk): for very large vocab, split the LM head into its own tiled
    # pallas_call (tm~256-512 rows x tn~512-1024 vocab lanes) instead of a
    # full-vocab output block per token block.
    out_ref[...] = jax.lax.dot_general(
        h.astype(md), lm_w_ref[...],
        dimension_numbers=(((1,), (1,)), ((), ())),
        preferred_element_type=jnp.float32)


LAYER_PARAM_ORDER = ("ln1_g", "ln1_b", "wq", "wk", "wv", "bq", "bk", "bv",
                     "wo", "bo", "ln2_g", "ln2_b", "w1", "b1", "w2", "b2")


def _full_spec(p):
    # Grid-invariant full-array block (weights stay VMEM-resident, no re-DMA).
    return pl.BlockSpec(p.shape, lambda *_, nd=p.ndim: (0,) * nd)


def transformer_with_lm_head(x, params, *, num_heads,
                             target_block_rows=256, vmem_limit_bytes=None):
    """Full forward: embeddings (JAX) -> fused layers+LM-head Pallas kernel."""
    B, S = x.shape
    tok = params["tok_emb"]                 # (V, D) f32
    pos = params["pos_emb"]                 # (V, D) f32 (module sizes pos table by vocab)
    V, D = tok.shape

    # Embedding gather + positional add (dropout == identity at eval).
    # TODO(synk): could be folded into the kernel via scalar-prefetched token
    # ids; XLA fuses this gather+add well so it is left outside.
    h = (tok[x] + pos[:S][None, :, :]).reshape(B * S, D).astype(jnp.float32)

    # Whole sequences per block; aim for ~target_block_rows token rows.  Keep
    # batch_tile a divisor of B so no padded tail block is ever computed.
    # (On v7x, multiple "parallel" blocks shard across the 2 TensorCores; on
    # single-core v5e/v6e a single big block is best.)
    batch_tile = max(1, min(B, target_block_rows // max(S, 1)))
    while B % batch_tile:
        batch_tile -= 1
    tt = batch_tile * S
    n_blocks = B // batch_tile

    stacked = [params[name] for name in LAYER_PARAM_ORDER]
    lm_w = params["lm_head_w"]

    cp_kwargs = dict(dimension_semantics=("parallel",))
    if vmem_limit_bytes is not None:
        # e.g. raise on v5e (16 MiB default scoped) / budget explicitly on v7x (64 MiB).
        cp_kwargs["vmem_limit_bytes"] = vmem_limit_bytes

    logits = pl.pallas_call(
        functools.partial(fused_forward_kernel, seq_len=S, num_heads=num_heads),
        out_shape=jax.ShapeDtypeStruct((B * S, V), jnp.float32),
        grid=(n_blocks,),
        in_specs=[pl.BlockSpec((tt, D), lambda b: (b, 0))]
                 + [_full_spec(p) for p in stacked]
                 + [_full_spec(lm_w)],
        out_specs=pl.BlockSpec((tt, V), lambda b: (b, 0)),
        compiler_params=pltpu.CompilerParams(**cp_kwargs),
    )(h, *stacked, lm_w)
    return logits.reshape(B, S, V)


# ----------------------------------------------------------------------------
# Parameter construction (module-style layout) + one-time kernel-layout repack.
# ----------------------------------------------------------------------------
def init_params(key, vocab, D, hidden, num_layers, std=0.02):
    keys = jax.random.split(key, 2 + num_layers)
    tok = std * jax.random.normal(keys[0], (vocab, D), jnp.float32)
    pos = std * jax.random.normal(keys[1], (vocab, D), jnp.float32)
    layers = []
    for i in range(num_layers):
        ks = jax.random.split(keys[2 + i], 6)
        layers.append(dict(
            ln1_g=std * jax.random.normal(ks[0], (1, D), jnp.float32),
            ln1_b=jnp.zeros((1, D), jnp.float32),
            wqkv=std * jax.random.normal(ks[1], (D, 3 * D), jnp.float32),
            bqkv=jnp.zeros((1, 3 * D), jnp.float32),
            wo=std * jax.random.normal(ks[2], (D, D), jnp.float32),
            bo=jnp.zeros((1, D), jnp.float32),
            ln2_g=std * jax.random.normal(ks[3], (1, D), jnp.float32),
            ln2_b=jnp.zeros((1, D), jnp.float32),
            w1=std * jax.random.normal(ks[4], (D, hidden), jnp.float32),
            b1=jnp.zeros((1, hidden), jnp.float32),
            w2=std * jax.random.normal(ks[5], (hidden, D), jnp.float32),
            b2=jnp.zeros((1, D), jnp.float32),
        ))
    return dict(tok_emb=tok, pos_emb=pos, layers=layers)


def prepare_params(raw, num_heads):
    """One-time repack: stack per-layer weights on a leading L axis, cast matmul
    weights to bf16 once, and fold 1/sqrt(head_dim) into the query projection."""
    tok = raw["tok_emb"]
    D = tok.shape[1]
    hd = D // num_heads
    scale = 1.0 / math.sqrt(hd)
    layers = raw["layers"]

    def stack(fn):
        return jnp.stack([fn(lp) for lp in layers], axis=0)

    return dict(
        tok_emb=tok, pos_emb=raw["pos_emb"],
        lm_head_w=tok.astype(MATMUL_DTYPE),           # lm_head.weight tied to tok_emb
        ln1_g=stack(lambda lp: lp["ln1_g"]),
        ln1_b=stack(lambda lp: lp["ln1_b"]),
        wq=stack(lambda lp: (lp["wqkv"][:, :D] * scale).astype(MATMUL_DTYPE)),
        wk=stack(lambda lp: lp["wqkv"][:, D:2 * D].astype(MATMUL_DTYPE)),
        wv=stack(lambda lp: lp["wqkv"][:, 2 * D:].astype(MATMUL_DTYPE)),
        bq=stack(lambda lp: lp["bqkv"][:, :D] * scale),
        bk=stack(lambda lp: lp["bqkv"][:, D:2 * D]),
        bv=stack(lambda lp: lp["bqkv"][:, 2 * D:]),
        wo=stack(lambda lp: lp["wo"].astype(MATMUL_DTYPE)),
        bo=stack(lambda lp: lp["bo"]),
        ln2_g=stack(lambda lp: lp["ln2_g"]),
        ln2_b=stack(lambda lp: lp["ln2_b"]),
        w1=stack(lambda lp: lp["w1"].astype(MATMUL_DTYPE)),
        b1=stack(lambda lp: lp["b1"]),
        w2=stack(lambda lp: lp["w2"].astype(MATMUL_DTYPE)),
        b2=stack(lambda lp: lp["b2"]),
    )


if __name__ == "__main__":
    # small config implied by the module: vocab=128, embed_dim=32, hidden_dim=64,
    # num_heads=4, num_layers=2, batch=2, seq=8
    V, D, HID, L, NH = 128, 32, 64, 2, 4
    B, S = 2, 8
    key = jax.random.PRNGKey(0)
    pkey, xkey = jax.random.split(key)
    params = prepare_params(init_params(pkey, V, D, HID, L), NH)
    x = jax.random.randint(xkey, (B, S), 0, V, dtype=jnp.int32)

    fwd = jax.jit(functools.partial(transformer_with_lm_head, num_heads=NH))
    logits = fwd(x, params)
    jax.block_until_ready(logits)
    assert logits.shape == (B, S, V) and logits.dtype == jnp.float32
    assert bool(jnp.all(jnp.isfinite(logits)))
    # TODO(synk): nn.Dropout is stochastic; implemented as identity (eval-mode).
    print("KERNEL_OK")
</pallas_src>

<mosaic_0001>
module attributes {stable_mosaic.version = 11 : i64} {
  func.func @fused_forward_kernel(%arg0: i32, %arg1: memref<16x32xf32, #tpu.memory_space<vmem>>, %arg2: memref<2x1x32xf32, #tpu.memory_space<vmem>>, %arg3: memref<2x1x32xf32, #tpu.memory_space<vmem>>, %arg4: memref<2x32x32xbf16, #tpu.memory_space<vmem>>, %arg5: memref<2x32x32xbf16, #tpu.memory_space<vmem>>, %arg6: memref<2x32x32xbf16, #tpu.memory_space<vmem>>, %arg7: memref<2x1x32xf32, #tpu.memory_space<vmem>>, %arg8: memref<2x1x32xf32, #tpu.memory_space<vmem>>, %arg9: memref<2x1x32xf32, #tpu.memory_space<vmem>>, %arg10: memref<2x32x32xbf16, #tpu.memory_space<vmem>>, %arg11: memref<2x1x32xf32, #tpu.memory_space<vmem>>, %arg12: memref<2x1x32xf32, #tpu.memory_space<vmem>>, %arg13: memref<2x1x32xf32, #tpu.memory_space<vmem>>, %arg14: memref<2x32x64xbf16, #tpu.memory_space<vmem>>, %arg15: memref<2x1x64xf32, #tpu.memory_space<vmem>>, %arg16: memref<2x64x32xbf16, #tpu.memory_space<vmem>>, %arg17: memref<2x1x32xf32, #tpu.memory_space<vmem>>, %arg18: memref<128x32xbf16, #tpu.memory_space<vmem>>, %arg19: memref<16x128xf32, #tpu.memory_space<vmem>>) attributes {dimension_semantics = [#tpu.dimension_semantics<parallel>], iteration_bounds = array<i64: 1>, scalar_prefetch = 0 : i64, scratch_operands = 0 : i64, tpu.core_type = #tpu.core_type<tc>, window_params = [{transform_indices = @transform_0, window_bounds = array<i64: 16, 32>}, {pipeline_mode = #tpu.pipeline_mode<synchronous>, transform_indices = @transform_1, window_bounds = array<i64: 2, 1, 32>}, {pipeline_mode = #tpu.pipeline_mode<synchronous>, transform_indices = @transform_2, window_bounds = array<i64: 2, 1, 32>}, {pipeline_mode = #tpu.pipeline_mode<synchronous>, transform_indices = @transform_3, window_bounds = array<i64: 2, 32, 32>}, {pipeline_mode = #tpu.pipeline_mode<synchronous>, transform_indices = @transform_4, window_bounds = array<i64: 2, 32, 32>}, {pipeline_mode = #tpu.pipeline_mode<synchronous>, transform_indices = @transform_5, window_bounds = array<i64: 2, 32, 32>}, {pipeline_mode = #tpu.pipeline_mode<synchronous>, transform_indices = @transform_6, window_bounds = array<i64: 2, 1, 32>}, {pipeline_mode = #tpu.pipeline_mode<synchronous>, transform_indices = @transform_7, window_bounds = array<i64: 2, 1, 32>}, {pipeline_mode = #tpu.pipeline_mode<synchronous>, transform_indices = @transform_8, window_bounds = array<i64: 2, 1, 32>}, {pipeline_mode = #tpu.pipeline_mode<synchronous>, transform_indices = @transform_9, window_bounds = array<i64: 2, 32, 32>}, {pipeline_mode = #tpu.pipeline_mode<synchronous>, transform_indices = @transform_10, window_bounds = array<i64: 2, 1, 32>}, {pipeline_mode = #tpu.pipeline_mode<synchronous>, transform_indices = @transform_11, window_bounds = array<i64: 2, 1, 32>}, {pipeline_mode = #tpu.pipeline_mode<synchronous>, transform_indices = @transform_12, window_bounds = array<i64: 2, 1, 32>}, {pipeline_mode = #tpu.pipeline_mode<synchronous>, transform_indices = @transform_13, window_bounds = array<i64: 2, 32, 64>}, {pipeline_mode = #tpu.pipeline_mode<synchronous>, transform_indices = @transform_14, window_bounds = array<i64: 2, 1, 64>}, {pipeline_mode = #tpu.pipeline_mode<synchronous>, transform_indices = @transform_15, window_bounds = array<i64: 2, 64, 32>}, {pipeline_mode = #tpu.pipeline_mode<synchronous>, transform_indices = @transform_16, window_bounds = array<i64: 2, 1, 32>}, {pipeline_mode = #tpu.pipeline_mode<synchronous>, transform_indices = @transform_17, window_bounds = array<i64: 128, 32>}, {transform_indices = @transform_18, window_bounds = array<i64: 16, 128>}]} {
    %c0 = arith.constant 0 : index
    %c0_0 = arith.constant 0 : index
    %0 = vector.load %arg1[%c0, %c0_0] : memref<16x32xf32, #tpu.memory_space<vmem>>, vector<16x32xf32>
    %1 = tpu.iota {dimensions = array<i32: 0>} : vector<8x8xi32>
    %2 = tpu.iota {dimensions = array<i32: 1>} : vector<8x8xi32>
    %3 = arith.cmpi sle, %2, %1 : vector<8x8xi32>
    %4 = vector.shape_cast %3 : vector<8x8xi1> to vector<1x8x8xi1>
    %c0_1 = arith.constant 0 : index
    %c0_2 = arith.constant 0 : index
    %c0_3 = arith.constant 0 : index
    %5 = vector.load %arg2[%c0_1, %c0_2, %c0_3] : memref<2x1x32xf32, #tpu.memory_space<vmem>>, vector<1x1x32xf32>
    %6 = vector.shape_cast %5 : vector<1x1x32xf32> to vector<1x32xf32>
    %c0_4 = arith.constant 0 : index
    %c0_5 = arith.constant 0 : index
    %c0_6 = arith.constant 0 : index
    %7 = vector.load %arg3[%c0_4, %c0_5, %c0_6] : memref<2x1x32xf32, #tpu.memory_space<vmem>>, vector<1x1x32xf32>
    %8 = vector.shape_cast %7 : vector<1x1x32xf32> to vector<1x32xf32>
    %cst = arith.constant dense<0.000000e+00> : vector<16xf32>
    %9 = vector.multi_reduction <add>, %0, %cst [1] : vector<16x32xf32> to vector<16xf32>
    %10 = vector.shape_cast %9 : vector<16xf32> to vector<16x1xf32>
    %cst_7 = arith.constant 3.200000e+01 : f32
    %11 = vector.broadcast %cst_7 : f32 to vector<16x1xf32>
    %12 = arith.divf %10, %11 : vector<16x1xf32>
    %13 = vector.broadcast %12 : vector<16x1xf32> to vector<16x32xf32>
    %14 = arith.subf %0, %13 : vector<16x32xf32>
    %15 = arith.mulf %14, %14 : vector<16x32xf32>
    %cst_8 = arith.constant dense<0.000000e+00> : vector<16xf32>
    %16 = vector.multi_reduction <add>, %15, %cst_8 [1] : vector<16x32xf32> to vector<16xf32>
    %17 = vector.shape_cast %16 : vector<16xf32> to vector<16x1xf32>
    %cst_9 = arith.constant 3.200000e+01 : f32
    %18 = vector.broadcast %cst_9 : f32 to vector<16x1xf32>
    %19 = arith.divf %17, %18 : vector<16x1xf32>
    %20 = vector.broadcast %12 : vector<16x1xf32> to vector<16x32xf32>
    %21 = arith.subf %0, %20 : vector<16x32xf32>
    %cst_10 = arith.constant 9.99999996E-13 : f32
    %22 = vector.broadcast %cst_10 : f32 to vector<16x1xf32>
    %23 = arith.addf %19, %22 : vector<16x1xf32>
    %24 = math.rsqrt %23 : vector<16x1xf32>
    %25 = vector.broadcast %24 : vector<16x1xf32> to vector<16x32xf32>
    %26 = arith.mulf %21, %25 : vector<16x32xf32>
    %27 = vector.broadcast %6 : vector<1x32xf32> to vector<16x32xf32>
    %28 = arith.mulf %26, %27 : vector<16x32xf32>
    %29 = vector.broadcast %8 : vector<1x32xf32> to vector<16x32xf32>
    %30 = arith.addf %28, %29 : vector<16x32xf32>
    %31 = arith.truncf %30 : vector<16x32xf32> to vector<16x32xbf16>
    %c0_11 = arith.constant 0 : index
    %c0_12 = arith.constant 0 : index
    %c0_13 = arith.constant 0 : index
    %32 = vector.load %arg4[%c0_11, %c0_12, %c0_13] : memref<2x32x32xbf16, #tpu.memory_space<vmem>>, vector<1x32x32xbf16>
    %33 = vector.shape_cast %32 : vector<1x32x32xbf16> to vector<32x32xbf16>
    %cst_14 = arith.constant dense<0.000000e+00> : vector<16x32xf32>
    %34 = tpu.matmul %31, %33, %cst_14 {dimension_numbers = #tpu.dot_dimension_numbers<[1], [0], [0], [1], [0, 0, 1, 1], [], []>} : vector<16x32xbf16>, vector<32x32xbf16>, vector<16x32xf32> -> vector<16x32xf32>
    %c0_15 = arith.constant 0 : index
    %c0_16 = arith.constant 0 : index
    %c0_17 = arith.constant 0 : index
    %35 = vector.load %arg7[%c0_15, %c0_16, %c0_17] : memref<2x1x32xf32, #tpu.memory_space<vmem>>, vector<1x1x32xf32>
    %36 = vector.shape_cast %35 : vector<1x1x32xf32> to vector<1x32xf32>
    %37 = vector.broadcast %36 : vector<1x32xf32> to vector<16x32xf32>
    %38 = arith.addf %34, %37 : vector<16x32xf32>
    %c0_18 = arith.constant 0 : index
    %c0_19 = arith.constant 0 : index
    %c0_20 = arith.constant 0 : index
    %39 = vector.load %arg5[%c0_18, %c0_19, %c0_20] : memref<2x32x32xbf16, #tpu.memory_space<vmem>>, vector<1x32x32xbf16>
    %40 = vector.shape_cast %39 : vector<1x32x32xbf16> to vector<32x32xbf16>
    %cst_21 = arith.constant dense<0.000000e+00> : vector<16x32xf32>
    %41 = tpu.matmul %31, %40, %cst_21 {dimension_numbers = #tpu.dot_dimension_numbers<[1], [0], [0], [1], [0, 0, 1, 1], [], []>} : vector<16x32xbf16>, vector<32x32xbf16>, vector<16x32xf32> -> vector<16x32xf32>
    %c0_22 = arith.constant 0 : index
    %c0_23 = arith.constant 0 : index
    %c0_24 = arith.constant 0 : index
    %42 = vector.load %arg8[%c0_22, %c0_23, %c0_24] : memref<2x1x32xf32, #tpu.memory_space<vmem>>, vector<1x1x32xf32>
    %43 = vector.shape_cast %42 : vector<1x1x32xf32> to vector<1x32xf32>
    %44 = vector.broadcast %43 : vector<1x32xf32> to vector<16x32xf32>
    %45 = arith.addf %41, %44 : vector<16x32xf32>
    %c0_25 = arith.constant 0 : index
    %c0_26 = arith.constant 0 : index
    %c0_27 = arith.constant 0 : index
    %46 = vector.load %arg6[%c0_25, %c0_26, %c0_27] : memref<2x32x32xbf16, #tpu.memory_space<vmem>>, vector<1x32x32xbf16>
    %47 = vector.shape_cast %46 : vector<1x32x32xbf16> to vector<32x32xbf16>
    %cst_28 = arith.constant dense<0.000000e+00> : vector<16x32xf32>
    %48 = tpu.matmul %31, %47, %cst_28 {dimension_numbers = #tpu.dot_dimension_numbers<[1], [0], [0], [1], [0, 0, 1, 1], [], []>} : vector<16x32xbf16>, vector<32x32xbf16>, vector<16x32xf32> -> vector<16x32xf32>
    %c0_29 = arith.constant 0 : index
    %c0_30 = arith.constant 0 : index
    %c0_31 = arith.constant 0 : index
    %49 = vector.load %arg9[%c0_29, %c0_30, %c0_31] : memref<2x1x32xf32, #tpu.memory_space<vmem>>, vector<1x1x32xf32>
    %50 = vector.shape_cast %49 : vector<1x1x32xf32> to vector<1x32xf32>
    %51 = vector.broadcast %50 : vector<1x32xf32> to vector<16x32xf32>
    %52 = arith.addf %48, %51 : vector<16x32xf32>
    %53 = vector.extract_strided_slice %38 {offsets = [0, 0], sizes = [16, 8], strides = [1, 1]} : vector<16x32xf32> to vector<16x8xf32>
    %54 = vector.shape_cast %53 : vector<16x8xf32> to vector<2x8x8xf32>
    %55 = vector.extract_strided_slice %38 {offsets = [0, 8], sizes = [16, 8], strides = [1, 1]} : vector<16x32xf32> to vector<16x8xf32>
    %56 = vector.shape_cast %55 : vector<16x8xf32> to vector<2x8x8xf32>
    %57 = vector.extract_strided_slice %38 {offsets = [0, 16], sizes = [16, 8], strides = [1, 1]} : vector<16x32xf32> to vector<16x8xf32>
    %58 = vector.shape_cast %57 : vector<16x8xf32> to vector<2x8x8xf32>
    %59 = vector.extract_strided_slice %38 {offsets = [0, 24], sizes = [16, 8], strides = [1, 1]} : vector<16x32xf32> to vector<16x8xf32>
    %60 = vector.shape_cast %59 : vector<16x8xf32> to vector<2x8x8xf32>
    %61 = tpu.concatenate %54, %56, %58, %60 in 0 : vector<2x8x8xf32>, vector<2x8x8xf32>, vector<2x8x8xf32>, vector<2x8x8xf32> -> vector<8x8x8xf32>
    %62 = arith.truncf %61 : vector<8x8x8xf32> to vector<8x8x8xbf16>
    %63 = vector.extract_strided_slice %45 {offsets = [0, 0], sizes = [16, 8], strides = [1, 1]} : vector<16x32xf32> to vector<16x8xf32>
    %64 = vector.shape_cast %63 : vector<16x8xf32> to vector<2x8x8xf32>
    %65 = vector.extract_strided_slice %45 {offsets = [0, 8], sizes = [16, 8], strides = [1, 1]} : vector<16x32xf32> to vector<16x8xf32>
    %66 = vector.shape_cast %65 : vector<16x8xf32> to vector<2x8x8xf32>
    %67 = vector.extract_strided_slice %45 {offsets = [0, 16], sizes = [16, 8], strides = [1, 1]} : vector<16x32xf32> to vector<16x8xf32>
    %68 = vector.shape_cast %67 : vector<16x8xf32> to vector<2x8x8xf32>
    %69 = vector.extract_strided_slice %45 {offsets = [0, 24], sizes = [16, 8], strides = [1, 1]} : vector<16x32xf32> to vector<16x8xf32>
    %70 = vector.shape_cast %69 : vector<16x8xf32> to vector<2x8x8xf32>
    %71 = tpu.concatenate %64, %66, %68, %70 in 0 : vector<2x8x8xf32>, vector<2x8x8xf32>, vector<2x8x8xf32>, vector<2x8x8xf32> -> vector<8x8x8xf32>
    %72 = arith.truncf %71 : vector<8x8x8xf32> to vector<8x8x8xbf16>
    %73 = vector.extract_strided_slice %52 {offsets = [0, 0], sizes = [16, 8], strides = [1, 1]} : vector<16x32xf32> to vector<16x8xf32>
    %74 = vector.shape_cast %73 : vector<16x8xf32> to vector<2x8x8xf32>
    %75 = vector.extract_strided_slice %52 {offsets = [0, 8], sizes = [16, 8], strides = [1, 1]} : vector<16x32xf32> to vector<16x8xf32>
    %76 = vector.shape_cast %75 : vector<16x8xf32> to vector<2x8x8xf32>
    %77 = vector.extract_strided_slice %52 {offsets = [0, 16], sizes = [16, 8], strides = [1, 1]} : vector<16x32xf32> to vector<16x8xf32>
    %78 = vector.shape_cast %77 : vector<16x8xf32> to vector<2x8x8xf32>
    %79 = vector.extract_strided_slice %52 {offsets = [0, 24], sizes = [16, 8], strides = [1, 1]} : vector<16x32xf32> to vector<16x8xf32>
    %80 = vector.shape_cast %79 : vector<16x8xf32> to vector<2x8x8xf32>
    %81 = tpu.concatenate %74, %76, %78, %80 in 0 : vector<2x8x8xf32>, vector<2x8x8xf32>, vector<2x8x8xf32>, vector<2x8x8xf32> -> vector<8x8x8xf32>
    %82 = arith.truncf %81 : vector<8x8x8xf32> to vector<8x8x8xbf16>
    "tpu.trace_start"() <{level = 10 : i32, message = "bqd,bkd->bqk"}> : () -> ()
    %cst_32 = arith.constant dense<0.000000e+00> : vector<8x8x8xf32>
    %83 = tpu.matmul %62, %72, %cst_32 {dimension_numbers = #tpu.dot_dimension_numbers<[2], [2], [1], [1], [0, 0, 0, 1, 1, 1], [0], [0]>} : vector<8x8x8xbf16>, vector<8x8x8xbf16>, vector<8x8x8xf32> -> vector<8x8x8xf32>
    %cst_33 = arith.constant -1.000000e+30 : f32
    "tpu.trace_stop"() : () -> ()
    %84 = vector.shape_cast %4 : vector<1x8x8xi1> to vector<1x8x8xi1>
    %85 = vector.broadcast %84 : vector<1x8x8xi1> to vector<8x8x8xi1>
    %86 = vector.broadcast %cst_33 : f32 to vector<8x8x8xf32>
    %87 = arith.select %85, %83, %86 : vector<8x8x8xi1>, vector<8x8x8xf32>
    %cst_34 = arith.constant dense<0xFF800000> : vector<8x8xf32>
    %88 = vector.multi_reduction <maximumf>, %87, %cst_34 [2] : vector<8x8x8xf32> to vector<8x8xf32>
    %89 = vector.shape_cast %88 : vector<8x8xf32> to vector<8x8x1xf32>
    %90 = vector.broadcast %89 : vector<8x8x1xf32> to vector<8x8x8xf32>
    %91 = arith.subf %87, %90 : vector<8x8x8xf32>
    %92 = math.exp %91 : vector<8x8x8xf32>
    %cst_35 = arith.constant dense<0.000000e+00> : vector<8x8xf32>
    %93 = vector.multi_reduction <add>, %92, %cst_35 [2] : vector<8x8x8xf32> to vector<8x8xf32>
    %94 = vector.shape_cast %93 : vector<8x8xf32> to vector<8x8x1xf32>
    %95 = tpu.reciprocal %94 {approx = true} : vector<8x8x1xf32> -> vector<8x8x1xf32>
    %96 = vector.broadcast %95 : vector<8x8x1xf32> to vector<8x8x8xf32>
    %97 = arith.mulf %92, %96 : vector<8x8x8xf32>
    %98 = arith.truncf %97 : vector<8x8x8xf32> to vector<8x8x8xbf16>
    "tpu.trace_start"() <{level = 10 : i32, message = "bqk,bkd->bqd"}> : () -> ()
    %cst_36 = arith.constant dense<0.000000e+00> : vector<8x8x8xf32>
    %99 = tpu.matmul %98, %82, %cst_36 {dimension_numbers = #tpu.dot_dimension_numbers<[2], [1], [1], [2], [0, 0, 0, 1, 1, 2], [0], [0]>} : vector<8x8x8xbf16>, vector<8x8x8xbf16>, vector<8x8x8xf32> -> vector<8x8x8xf32>
    "tpu.trace_stop"() : () -> ()
    %100 = vector.extract_strided_slice %99 {offsets = [0, 0, 0], sizes = [2, 8, 8], strides = [1, 1, 1]} : vector<8x8x8xf32> to vector<2x8x8xf32>
    %101 = vector.shape_cast %100 : vector<2x8x8xf32> to vector<16x8xf32>
    %102 = vector.extract_strided_slice %99 {offsets = [2, 0, 0], sizes = [2, 8, 8], strides = [1, 1, 1]} : vector<8x8x8xf32> to vector<2x8x8xf32>
    %103 = vector.shape_cast %102 : vector<2x8x8xf32> to vector<16x8xf32>
    %104 = vector.extract_strided_slice %99 {offsets = [4, 0, 0], sizes = [2, 8, 8], strides = [1, 1, 1]} : vector<8x8x8xf32> to vector<2x8x8xf32>
    %105 = vector.shape_cast %104 : vector<2x8x8xf32> to vector<16x8xf32>
    %106 = vector.extract_strided_slice %99 {offsets = [6, 0, 0], sizes = [2, 8, 8], strides = [1, 1, 1]} : vector<8x8x8xf32> to vector<2x8x8xf32>
    %107 = vector.shape_cast %106 : vector<2x8x8xf32> to vector<16x8xf32>
    %108 = tpu.concatenate %101, %103, %105, %107 in 1 : vector<16x8xf32>, vector<16x8xf32>, vector<16x8xf32>, vector<16x8xf32> -> vector<16x32xf32>
    %c0_37 = arith.constant 0 : index
    %c0_38 = arith.constant 0 : index
    %c0_39 = arith.constant 0 : index
    %109 = vector.load %arg10[%c0_37, %c0_38, %c0_39] : memref<2x32x32xbf16, #tpu.memory_space<vmem>>, vector<1x32x32xbf16>
    %110 = vector.shape_cast %109 : vector<1x32x32xbf16> to vector<32x32xbf16>
    %111 = arith.truncf %108 : vector<16x32xf32> to vector<16x32xbf16>
    %cst_40 = arith.constant dense<0.000000e+00> : vector<16x32xf32>
    %112 = tpu.matmul %111, %110, %cst_40 {dimension_numbers = #tpu.dot_dimension_numbers<[1], [0], [0], [1], [0, 0, 1, 1], [], []>} : vector<16x32xbf16>, vector<32x32xbf16>, vector<16x32xf32> -> vector<16x32xf32>
    %c0_41 = arith.constant 0 : index
    %c0_42 = arith.constant 0 : index
    %c0_43 = arith.constant 0 : index
    %113 = vector.load %arg11[%c0_41, %c0_42, %c0_43] : memref<2x1x32xf32, #tpu.memory_space<vmem>>, vector<1x1x32xf32>
    %114 = vector.shape_cast %113 : vector<1x1x32xf32> to vector<1x32xf32>
    %115 = vector.broadcast %114 : vector<1x32xf32> to vector<16x32xf32>
    %116 = arith.addf %112, %115 : vector<16x32xf32>
    %117 = arith.addf %116, %30 : vector<16x32xf32>
    %c0_44 = arith.constant 0 : index
    %c0_45 = arith.constant 0 : index
    %c0_46 = arith.constant 0 : index
    %118 = vector.load %arg12[%c0_44, %c0_45, %c0_46] : memref<2x1x32xf32, #tpu.memory_space<vmem>>, vector<1x1x32xf32>
    %119 = vector.shape_cast %118 : vector<1x1x32xf32> to vector<1x32xf32>
    %c0_47 = arith.constant 0 : index
    %c0_48 = arith.constant 0 : index
    %c0_49 = arith.constant 0 : index
    %120 = vector.load %arg13[%c0_47, %c0_48, %c0_49] : memref<2x1x32xf32, #tpu.memory_space<vmem>>, vector<1x1x32xf32>
    %121 = vector.shape_cast %120 : vector<1x1x32xf32> to vector<1x32xf32>
    %cst_50 = arith.constant dense<0.000000e+00> : vector<16xf32>
    %122 = vector.multi_reduction <add>, %117, %cst_50 [1] : vector<16x32xf32> to vector<16xf32>
    %123 = vector.shape_cast %122 : vector<16xf32> to vector<16x1xf32>
    %cst_51 = arith.constant 3.200000e+01 : f32
    %124 = vector.broadcast %cst_51 : f32 to vector<16x1xf32>
    %125 = arith.divf %123, %124 : vector<16x1xf32>
    %126 = vector.broadcast %125 : vector<16x1xf32> to vector<16x32xf32>
    %127 = arith.subf %117, %126 : vector<16x32xf32>
    %128 = arith.mulf %127, %127 : vector<16x32xf32>
    %cst_52 = arith.constant dense<0.000000e+00> : vector<16xf32>
    %129 = vector.multi_reduction <add>, %128, %cst_52 [1] : vector<16x32xf32> to vector<16xf32>
    %130 = vector.shape_cast %129 : vector<16xf32> to vector<16x1xf32>
    %cst_53 = arith.constant 3.200000e+01 : f32
    %131 = vector.broadcast %cst_53 : f32 to vector<16x1xf32>
    %132 = arith.divf %130, %131 : vector<16x1xf32>
    %133 = vector.broadcast %125 : vector<16x1xf32> to vector<16x32xf32>
    %134 = arith.subf %117, %133 : vector<16x32xf32>
    %cst_54 = arith.constant 9.99999996E-13 : f32
    %135 = vector.broadcast %cst_54 : f32 to vector<16x1xf32>
    %136 = arith.addf %132, %135 : vector<16x1xf32>
    %137 = math.rsqrt %136 : vector<16x1xf32>
    %138 = vector.broadcast %137 : vector<16x1xf32> to vector<16x32xf32>
    %139 = arith.mulf %134, %138 : vector<16x32xf32>
    %140 = vector.broadcast %119 : vector<1x32xf32> to vector<16x32xf32>
    %141 = arith.mulf %139, %140 : vector<16x32xf32>
    %142 = vector.broadcast %121 : vector<1x32xf32> to vector<16x32xf32>
    %143 = arith.addf %141, %142 : vector<16x32xf32>
    %c0_55 = arith.constant 0 : index
    %c0_56 = arith.constant 0 : index
    %c0_57 = arith.constant 0 : index
    %144 = vector.load %arg14[%c0_55, %c0_56, %c0_57] : memref<2x32x64xbf16, #tpu.memory_space<vmem>>, vector<1x32x64xbf16>
    %145 = vector.shape_cast %144 : vector<1x32x64xbf16> to vector<32x64xbf16>
    %146 = arith.truncf %143 : vector<16x32xf32> to vector<16x32xbf16>
    %cst_58 = arith.constant dense<0.000000e+00> : vector<16x64xf32>
    %147 = tpu.matmul %146, %145, %cst_58 {dimension_numbers = #tpu.dot_dimension_numbers<[1], [0], [0], [1], [0, 0, 1, 1], [], []>} : vector<16x32xbf16>, vector<32x64xbf16>, vector<16x64xf32> -> vector<16x64xf32>
    %c0_59 = arith.constant 0 : index
    %c0_60 = arith.constant 0 : index
    %c0_61 = arith.constant 0 : index
    %148 = vector.load %arg15[%c0_59, %c0_60, %c0_61] : memref<2x1x64xf32, #tpu.memory_space<vmem>>, vector<1x1x64xf32>
    %149 = vector.shape_cast %148 : vector<1x1x64xf32> to vector<1x64xf32>
    %150 = vector.broadcast %149 : vector<1x64xf32> to vector<16x64xf32>
    %151 = arith.addf %147, %150 : vector<16x64xf32>
    %cst_62 = arith.constant 0.000000e+00 : f32
    %152 = vector.broadcast %cst_62 : f32 to vector<16x64xf32>
    %153 = arith.maximumf %151, %152 : vector<16x64xf32>
    %c0_63 = arith.constant 0 : index
    %c0_64 = arith.constant 0 : index
    %c0_65 = arith.constant 0 : index
    %154 = vector.load %arg16[%c0_63, %c0_64, %c0_65] : memref<2x64x32xbf16, #tpu.memory_space<vmem>>, vector<1x64x32xbf16>
    %155 = vector.shape_cast %154 : vector<1x64x32xbf16> to vector<64x32xbf16>
    %156 = arith.truncf %153 : vector<16x64xf32> to vector<16x64xbf16>
    %cst_66 = arith.constant dense<0.000000e+00> : vector<16x32xf32>
    %157 = tpu.matmul %156, %155, %cst_66 {dimension_numbers = #tpu.dot_dimension_numbers<[1], [0], [0], [1], [0, 0, 1, 1], [], []>} : vector<16x64xbf16>, vector<64x32xbf16>, vector<16x32xf32> -> vector<16x32xf32>
    %c0_67 = arith.constant 0 : index
    %c0_68 = arith.constant 0 : index
    %c0_69 = arith.constant 0 : index
    %158 = vector.load %arg17[%c0_67, %c0_68, %c0_69] : memref<2x1x32xf32, #tpu.memory_space<vmem>>, vector<1x1x32xf32>
    %159 = vector.shape_cast %158 : vector<1x1x32xf32> to vector<1x32xf32>
    %160 = vector.broadcast %159 : vector<1x32xf32> to vector<16x32xf32>
    %161 = arith.addf %157, %160 : vector<16x32xf32>
    %162 = arith.addf %161, %143 : vector<16x32xf32>
    %c1 = arith.constant 1 : index
    %c0_70 = arith.constant 0 : index
    %c0_71 = arith.constant 0 : index
    %163 = vector.load %arg2[%c1, %c0_70, %c0_71] : memref<2x1x32xf32, #tpu.memory_space<vmem>>, vector<1x1x32xf32>
    %164 = vector.shape_cast %163 : vector<1x1x32xf32> to vector<1x32xf32>
    %c1_72 = arith.constant 1 : index
    %c0_73 = arith.constant 0 : index
    %c0_74 = arith.constant 0 : index
    %165 = vector.load %arg3[%c1_72, %c0_73, %c0_74] : memref<2x1x32xf32, #tpu.memory_space<vmem>>, vector<1x1x32xf32>
    %166 = vector.shape_cast %165 : vector<1x1x32xf32> to vector<1x32xf32>
    %cst_75 = arith.constant dense<0.000000e+00> : vector<16xf32>
    %167 = vector.multi_reduction <add>, %162, %cst_75 [1] : vector<16x32xf32> to vector<16xf32>
    %168 = vector.shape_cast %167 : vector<16xf32> to vector<16x1xf32>
    %cst_76 = arith.constant 3.200000e+01 : f32
    %169 = vector.broadcast %cst_76 : f32 to vector<16x1xf32>
    %170 = arith.divf %168, %169 : vector<16x1xf32>
    %171 = vector.broadcast %170 : vector<16x1xf32> to vector<16x32xf32>
    %172 = arith.subf %162, %171 : vector<16x32xf32>
    %173 = arith.mulf %172, %172 : vector<16x32xf32>
    %cst_77 = arith.constant dense<0.000000e+00> : vector<16xf32>
    %174 = vector.multi_reduction <add>, %173, %cst_77 [1] : vector<16x32xf32> to vector<16xf32>
    %175 = vector.shape_cast %174 : vector<16xf32> to vector<16x1xf32>
    %cst_78 = arith.constant 3.200000e+01 : f32
    %176 = vector.broadcast %cst_78 : f32 to vector<16x1xf32>
    %177 = arith.divf %175, %176 : vector<16x1xf32>
    %178 = vector.broadcast %170 : vector<16x1xf32> to vector<16x32xf32>
    %179 = arith.subf %162, %178 : vector<16x32xf32>
    %cst_79 = arith.constant 9.99999996E-13 : f32
    %180 = vector.broadcast %cst_79 : f32 to vector<16x1xf32>
    %181 = arith.addf %177, %180 : vector<16x1xf32>
    %182 = math.rsqrt %181 : vector<16x1xf32>
    %183 = vector.broadcast %182 : vector<16x1xf32> to vector<16x32xf32>
    %184 = arith.mulf %179, %183 : vector<16x32xf32>
    %185 = vector.broadcast %164 : vector<1x32xf32> to vector<16x32xf32>
    %186 = arith.mulf %184, %185 : vector<16x32xf32>
    %187 = vector.broadcast %166 : vector<1x32xf32> to vector<16x32xf32>
    %188 = arith.addf %186, %187 : vector<16x32xf32>
    %189 = arith.truncf %188 : vector<16x32xf32> to vector<16x32xbf16>
    %c1_80 = arith.constant 1 : index
    %c0_81 = arith.constant 0 : index
    %c0_82 = arith.constant 0 : index
    %190 = vector.load %arg4[%c1_80, %c0_81, %c0_82] : memref<2x32x32xbf16, #tpu.memory_space<vmem>>, vector<1x32x32xbf16>
    %191 = vector.shape_cast %190 : vector<1x32x32xbf16> to vector<32x32xbf16>
    %cst_83 = arith.constant dense<0.000000e+00> : vector<16x32xf32>
    %192 = tpu.matmul %189, %191, %cst_83 {dimension_numbers = #tpu.dot_dimension_numbers<[1], [0], [0], [1], [0, 0, 1, 1], [], []>} : vector<16x32xbf16>, vector<32x32xbf16>, vector<16x32xf32> -> vector<16x32xf32>
    %c1_84 = arith.constant 1 : index
    %c0_85 = arith.constant 0 : index
    %c0_86 = arith.constant 0 : index
    %193 = vector.load %arg7[%c1_84, %c0_85, %c0_86] : memref<2x1x32xf32, #tpu.memory_space<vmem>>, vector<1x1x32xf32>
    %194 = vector.shape_cast %193 : vector<1x1x32xf32> to vector<1x32xf32>
    %195 = vector.broadcast %194 : vector<1x32xf32> to vector<16x32xf32>
    %196 = arith.addf %192, %195 : vector<16x32xf32>
    %c1_87 = arith.constant 1 : index
    %c0_88 = arith.constant 0 : index
    %c0_89 = arith.constant 0 : index
    %197 = vector.load %arg5[%c1_87, %c0_88, %c0_89] : memref<2x32x32xbf16, #tpu.memory_space<vmem>>, vector<1x32x32xbf16>
    %198 = vector.shape_cast %197 : vector<1x32x32xbf16> to vector<32x32xbf16>
    %cst_90 = arith.constant dense<0.000000e+00> : vector<16x32xf32>
    %199 = tpu.matmul %189, %198, %cst_90 {dimension_numbers = #tpu.dot_dimension_numbers<[1], [0], [0], [1], [0, 0, 1, 1], [], []>} : vector<16x32xbf16>, vector<32x32xbf16>, vector<16x32xf32> -> vector<16x32xf32>
    %c1_91 = arith.constant 1 : index
    %c0_92 = arith.constant 0 : index
    %c0_93 = arith.constant 0 : index
    %200 = vector.load %arg8[%c1_91, %c0_92, %c0_93] : memref<2x1x32xf32, #tpu.memory_space<vmem>>, vector<1x1x32xf32>
    %201 = vector.shape_cast %200 : vector<1x1x32xf32> to vector<1x32xf32>
    %202 = vector.broadcast %201 : vector<1x32xf32> to vector<16x32xf32>
    %203 = arith.addf %199, %202 : vector<16x32xf32>
    %c1_94 = arith.constant 1 : index
    %c0_95 = arith.constant 0 : index
    %c0_96 = arith.constant 0 : index
    %204 = vector.load %arg6[%c1_94, %c0_95, %c0_96] : memref<2x32x32xbf16, #tpu.memory_space<vmem>>, vector<1x32x32xbf16>
    %205 = vector.shape_cast %204 : vector<1x32x32xbf16> to vector<32x32xbf16>
    %cst_97 = arith.constant dense<0.000000e+00> : vector<16x32xf32>
    %206 = tpu.matmul %189, %205, %cst_97 {dimension_numbers = #tpu.dot_dimension_numbers<[1], [0], [0], [1], [0, 0, 1, 1], [], []>} : vector<16x32xbf16>, vector<32x32xbf16>, vector<16x32xf32> -> vector<16x32xf32>
    %c1_98 = arith.constant 1 : index
    %c0_99 = arith.constant 0 : index
    %c0_100 = arith.constant 0 : index
    %207 = vector.load %arg9[%c1_98, %c0_99, %c0_100] : memref<2x1x32xf32, #tpu.memory_space<vmem>>, vector<1x1x32xf32>
    %208 = vector.shape_cast %207 : vector<1x1x32xf32> to vector<1x32xf32>
    %209 = vector.broadcast %208 : vector<1x32xf32> to vector<16x32xf32>
    %210 = arith.addf %206, %209 : vector<16x32xf32>
    %211 = vector.extract_strided_slice %196 {offsets = [0, 0], sizes = [16, 8], strides = [1, 1]} : vector<16x32xf32> to vector<16x8xf32>
    %212 = vector.shape_cast %211 : vector<16x8xf32> to vector<2x8x8xf32>
    %213 = vector.extract_strided_slice %196 {offsets = [0, 8], sizes = [16, 8], strides = [1, 1]} : vector<16x32xf32> to vector<16x8xf32>
    %214 = vector.shape_cast %213 : vector<16x8xf32> to vector<2x8x8xf32>
    %215 = vector.extract_strided_slice %196 {offsets = [0, 16], sizes = [16, 8], strides = [1, 1]} : vector<16x32xf32> to vector<16x8xf32>
    %216 = vector.shape_cast %215 : vector<16x8xf32> to vector<2x8x8xf32>
    %217 = vector.extract_strided_slice %196 {offsets = [0, 24], sizes = [16, 8], strides = [1, 1]} : vector<16x32xf32> to vector<16x8xf32>
    %218 = vector.shape_cast %217 : vector<16x8xf32> to vector<2x8x8xf32>
    %219 = tpu.concatenate %212, %214, %216, %218 in 0 : vector<2x8x8xf32>, vector<2x8x8xf32>, vector<2x8x8xf32>, vector<2x8x8xf32> -> vector<8x8x8xf32>
    %220 = arith.truncf %219 : vector<8x8x8xf32> to vector<8x8x8xbf16>
    %221 = vector.extract_strided_slice %203 {offsets = [0, 0], sizes = [16, 8], strides = [1, 1]} : vector<16x32xf32> to vector<16x8xf32>
    %222 = vector.shape_cast %221 : vector<16x8xf32> to vector<2x8x8xf32>
    %223 = vector.extract_strided_slice %203 {offsets = [0, 8], sizes = [16, 8], strides = [1, 1]} : vector<16x32xf32> to vector<16x8xf32>
    %224 = vector.shape_cast %223 : vector<16x8xf32> to vector<2x8x8xf32>
    %225 = vector.extract_strided_slice %203 {offsets = [0, 16], sizes = [16, 8], strides = [1, 1]} : vector<16x32xf32> to vector<16x8xf32>
    %226 = vector.shape_cast %225 : vector<16x8xf32> to vector<2x8x8xf32>
    %227 = vector.extract_strided_slice %203 {offsets = [0, 24], sizes = [16, 8], strides = [1, 1]} : vector<16x32xf32> to vector<16x8xf32>
    %228 = vector.shape_cast %227 : vector<16x8xf32> to vector<2x8x8xf32>
    %229 = tpu.concatenate %222, %224, %226, %228 in 0 : vector<2x8x8xf32>, vector<2x8x8xf32>, vector<2x8x8xf32>, vector<2x8x8xf32> -> vector<8x8x8xf32>
    %230 = arith.truncf %229 : vector<8x8x8xf32> to vector<8x8x8xbf16>
    %231 = vector.extract_strided_slice %210 {offsets = [0, 0], sizes = [16, 8], strides = [1, 1]} : vector<16x32xf32> to vector<16x8xf32>
    %232 = vector.shape_cast %231 : vector<16x8xf32> to vector<2x8x8xf32>
    %233 = vector.extract_strided_slice %210 {offsets = [0, 8], sizes = [16, 8], strides = [1, 1]} : vector<16x32xf32> to vector<16x8xf32>
    %234 = vector.shape_cast %233 : vector<16x8xf32> to vector<2x8x8xf32>
    %235 = vector.extract_strided_slice %210 {offsets = [0, 16], sizes = [16, 8], strides = [1, 1]} : vector<16x32xf32> to vector<16x8xf32>
    %236 = vector.shape_cast %235 : vector<16x8xf32> to vector<2x8x8xf32>
    %237 = vector.extract_strided_slice %210 {offsets = [0, 24], sizes = [16, 8], strides = [1, 1]} : vector<16x32xf32> to vector<16x8xf32>
    %238 = vector.shape_cast %237 : vector<16x8xf32> to vector<2x8x8xf32>
    %239 = tpu.concatenate %232, %234, %236, %238 in 0 : vector<2x8x8xf32>, vector<2x8x8xf32>, vector<2x8x8xf32>, vector<2x8x8xf32> -> vector<8x8x8xf32>
    %240 = arith.truncf %239 : vector<8x8x8xf32> to vector<8x8x8xbf16>
    "tpu.trace_start"() <{level = 10 : i32, message = "bqd,bkd->bqk"}> : () -> ()
    %cst_101 = arith.constant dense<0.000000e+00> : vector<8x8x8xf32>
    %241 = tpu.matmul %220, %230, %cst_101 {dimension_numbers = #tpu.dot_dimension_numbers<[2], [2], [1], [1], [0, 0, 0, 1, 1, 1], [0], [0]>} : vector<8x8x8xbf16>, vector<8x8x8xbf16>, vector<8x8x8xf32> -> vector<8x8x8xf32>
    %cst_102 = arith.constant -1.000000e+30 : f32
    "tpu.trace_stop"() : () -> ()
    %242 = vector.shape_cast %4 : vector<1x8x8xi1> to vector<1x8x8xi1>
    %243 = vector.broadcast %242 : vector<1x8x8xi1> to vector<8x8x8xi1>
    %244 = vector.broadcast %cst_102 : f32 to vector<8x8x8xf32>
    %245 = arith.select %243, %241, %244 : vector<8x8x8xi1>, vector<8x8x8xf32>
    %cst_103 = arith.constant dense<0xFF800000> : vector<8x8xf32>
    %246 = vector.multi_reduction <maximumf>, %245, %cst_103 [2] : vector<8x8x8xf32> to vector<8x8xf32>
    %247 = vector.shape_cast %246 : vector<8x8xf32> to vector<8x8x1xf32>
    %248 = vector.broadcast %247 : vector<8x8x1xf32> to vector<8x8x8xf32>
    %249 = arith.subf %245, %248 : vector<8x8x8xf32>
    %250 = math.exp %249 : vector<8x8x8xf32>
    %cst_104 = arith.constant dense<0.000000e+00> : vector<8x8xf32>
    %251 = vector.multi_reduction <add>, %250, %cst_104 [2] : vector<8x8x8xf32> to vector<8x8xf32>
    %252 = vector.shape_cast %251 : vector<8x8xf32> to vector<8x8x1xf32>
    %253 = tpu.reciprocal %252 {approx = true} : vector<8x8x1xf32> -> vector<8x8x1xf32>
    %254 = vector.broadcast %253 : vector<8x8x1xf32> to vector<8x8x8xf32>
    %255 = arith.mulf %250, %254 : vector<8x8x8xf32>
    %256 = arith.truncf %255 : vector<8x8x8xf32> to vector<8x8x8xbf16>
    "tpu.trace_start"() <{level = 10 : i32, message = "bqk,bkd->bqd"}> : () -> ()
    %cst_105 = arith.constant dense<0.000000e+00> : vector<8x8x8xf32>
    %257 = tpu.matmul %256, %240, %cst_105 {dimension_numbers = #tpu.dot_dimension_numbers<[2], [1], [1], [2], [0, 0, 0, 1, 1, 2], [0], [0]>} : vector<8x8x8xbf16>, vector<8x8x8xbf16>, vector<8x8x8xf32> -> vector<8x8x8xf32>
    "tpu.trace_stop"() : () -> ()
    %258 = vector.extract_strided_slice %257 {offsets = [0, 0, 0], sizes = [2, 8, 8], strides = [1, 1, 1]} : vector<8x8x8xf32> to vector<2x8x8xf32>
    %259 = vector.shape_cast %258 : vector<2x8x8xf32> to vector<16x8xf32>
    %260 = vector.extract_strided_slice %257 {offsets = [2, 0, 0], sizes = [2, 8, 8], strides = [1, 1, 1]} : vector<8x8x8xf32> to vector<2x8x8xf32>
    %261 = vector.shape_cast %260 : vector<2x8x8xf32> to vector<16x8xf32>
    %262 = vector.extract_strided_slice %257 {offsets = [4, 0, 0], sizes = [2, 8, 8], strides = [1, 1, 1]} : vector<8x8x8xf32> to vector<2x8x8xf32>
    %263 = vector.shape_cast %262 : vector<2x8x8xf32> to vector<16x8xf32>
    %264 = vector.extract_strided_slice %257 {offsets = [6, 0, 0], sizes = [2, 8, 8], strides = [1, 1, 1]} : vector<8x8x8xf32> to vector<2x8x8xf32>
    %265 = vector.shape_cast %264 : vector<2x8x8xf32> to vector<16x8xf32>
    %266 = tpu.concatenate %259, %261, %263, %265 in 1 : vector<16x8xf32>, vector<16x8xf32>, vector<16x8xf32>, vector<16x8xf32> -> vector<16x32xf32>
    %c1_106 = arith.constant 1 : index
    %c0_107 = arith.constant 0 : index
    %c0_108 = arith.constant 0 : index
    %267 = vector.load %arg10[%c1_106, %c0_107, %c0_108] : memref<2x32x32xbf16, #tpu.memory_space<vmem>>, vector<1x32x32xbf16>
    %268 = vector.shape_cast %267 : vector<1x32x32xbf16> to vector<32x32xbf16>
    %269 = arith.truncf %266 : vector<16x32xf32> to vector<16x32xbf16>
    %cst_109 = arith.constant dense<0.000000e+00> : vector<16x32xf32>
    %270 = tpu.matmul %269, %268, %cst_109 {dimension_numbers = #tpu.dot_dimension_numbers<[1], [0], [0], [1], [0, 0, 1, 1], [], []>} : vector<16x32xbf16>, vector<32x32xbf16>, vector<16x32xf32> -> vector<16x32xf32>
    %c1_110 = arith.constant 1 : index
    %c0_111 = arith.constant 0 : index
    %c0_112 = arith.constant 0 : index
    %271 = vector.load %arg11[%c1_110, %c0_111, %c0_112] : memref<2x1x32xf32, #tpu.memory_space<vmem>>, vector<1x1x32xf32>
    %272 = vector.shape_cast %271 : vector<1x1x32xf32> to vector<1x32xf32>
    %273 = vector.broadcast %272 : vector<1x32xf32> to vector<16x32xf32>
    %274 = arith.addf %270, %273 : vector<16x32xf32>
    %275 = arith.addf %274, %188 : vector<16x32xf32>
    %c1_113 = arith.constant 1 : index
    %c0_114 = arith.constant 0 : index
    %c0_115 = arith.constant 0 : index
    %276 = vector.load %arg12[%c1_113, %c0_114, %c0_115] : memref<2x1x32xf32, #tpu.memory_space<vmem>>, vector<1x1x32xf32>
    %277 = vector.shape_cast %276 : vector<1x1x32xf32> to vector<1x32xf32>
    %c1_116 = arith.constant 1 : index
    %c0_117 = arith.constant 0 : index
    %c0_118 = arith.constant 0 : index
    %278 = vector.load %arg13[%c1_116, %c0_117, %c0_118] : memref<2x1x32xf32, #tpu.memory_space<vmem>>, vector<1x1x32xf32>
    %279 = vector.shape_cast %278 : vector<1x1x32xf32> to vector<1x32xf32>
    %cst_119 = arith.constant dense<0.000000e+00> : vector<16xf32>
    %280 = vector.multi_reduction <add>, %275, %cst_119 [1] : vector<16x32xf32> to vector<16xf32>
    %281 = vector.shape_cast %280 : vector<16xf32> to vector<16x1xf32>
    %cst_120 = arith.constant 3.200000e+01 : f32
    %282 = vector.broadcast %cst_120 : f32 to vector<16x1xf32>
    %283 = arith.divf %281, %282 : vector<16x1xf32>
    %284 = vector.broadcast %283 : vector<16x1xf32> to vector<16x32xf32>
    %285 = arith.subf %275, %284 : vector<16x32xf32>
    %286 = arith.mulf %285, %285 : vector<16x32xf32>
    %cst_121 = arith.constant dense<0.000000e+00> : vector<16xf32>
    %287 = vector.multi_reduction <add>, %286, %cst_121 [1] : vector<16x32xf32> to vector<16xf32>
    %288 = vector.shape_cast %287 : vector<16xf32> to vector<16x1xf32>
    %cst_122 = arith.constant 3.200000e+01 : f32
    %289 = vector.broadcast %cst_122 : f32 to vector<16x1xf32>
    %290 = arith.divf %288, %289 : vector<16x1xf32>
    %291 = vector.broadcast %283 : vector<16x1xf32> to vector<16x32xf32>
    %292 = arith.subf %275, %291 : vector<16x32xf32>
    %cst_123 = arith.constant 9.99999996E-13 : f32
    %293 = vector.broadcast %cst_123 : f32 to vector<16x1xf32>
    %294 = arith.addf %290, %293 : vector<16x1xf32>
    %295 = math.rsqrt %294 : vector<16x1xf32>
    %296 = vector.broadcast %295 : vector<16x1xf32> to vector<16x32xf32>
    %297 = arith.mulf %292, %296 : vector<16x32xf32>
    %298 = vector.broadcast %277 : vector<1x32xf32> to vector<16x32xf32>
    %299 = arith.mulf %297, %298 : vector<16x32xf32>
    %300 = vector.broadcast %279 : vector<1x32xf32> to vector<16x32xf32>
    %301 = arith.addf %299, %300 : vector<16x32xf32>
    %c1_124 = arith.constant 1 : index
    %c0_125 = arith.constant 0 : index
    %c0_126 = arith.constant 0 : index
    %302 = vector.load %arg14[%c1_124, %c0_125, %c0_126] : memref<2x32x64xbf16, #tpu.memory_space<vmem>>, vector<1x32x64xbf16>
    %303 = vector.shape_cast %302 : vector<1x32x64xbf16> to vector<32x64xbf16>
    %304 = arith.truncf %301 : vector<16x32xf32> to vector<16x32xbf16>
    %cst_127 = arith.constant dense<0.000000e+00> : vector<16x64xf32>
    %305 = tpu.matmul %304, %303, %cst_127 {dimension_numbers = #tpu.dot_dimension_numbers<[1], [0], [0], [1], [0, 0, 1, 1], [], []>} : vector<16x32xbf16>, vector<32x64xbf16>, vector<16x64xf32> -> vector<16x64xf32>
    %c1_128 = arith.constant 1 : index
    %c0_129 = arith.constant 0 : index
    %c0_130 = arith.constant 0 : index
    %306 = vector.load %arg15[%c1_128, %c0_129, %c0_130] : memref<2x1x64xf32, #tpu.memory_space<vmem>>, vector<1x1x64xf32>
    %307 = vector.shape_cast %306 : vector<1x1x64xf32> to vector<1x64xf32>
    %308 = vector.broadcast %307 : vector<1x64xf32> to vector<16x64xf32>
    %309 = arith.addf %305, %308 : vector<16x64xf32>
    %cst_131 = arith.constant 0.000000e+00 : f32
    %310 = vector.broadcast %cst_131 : f32 to vector<16x64xf32>
    %311 = arith.maximumf %309, %310 : vector<16x64xf32>
    %c1_132 = arith.constant 1 : index
    %c0_133 = arith.constant 0 : index
    %c0_134 = arith.constant 0 : index
    %312 = vector.load %arg16[%c1_132, %c0_133, %c0_134] : memref<2x64x32xbf16, #tpu.memory_space<vmem>>, vector<1x64x32xbf16>
    %313 = vector.shape_cast %312 : vector<1x64x32xbf16> to vector<64x32xbf16>
    %314 = arith.truncf %311 : vector<16x64xf32> to vector<16x64xbf16>
    %cst_135 = arith.constant dense<0.000000e+00> : vector<16x32xf32>
    %315 = tpu.matmul %314, %313, %cst_135 {dimension_numbers = #tpu.dot_dimension_numbers<[1], [0], [0], [1], [0, 0, 1, 1], [], []>} : vector<16x64xbf16>, vector<64x32xbf16>, vector<16x32xf32> -> vector<16x32xf32>
    %c1_136 = arith.constant 1 : index
    %c0_137 = arith.constant 0 : index
    %c0_138 = arith.constant 0 : index
    %316 = vector.load %arg17[%c1_136, %c0_137, %c0_138] : memref<2x1x32xf32, #tpu.memory_space<vmem>>, vector<1x1x32xf32>
    %317 = vector.shape_cast %316 : vector<1x1x32xf32> to vector<1x32xf32>
    %318 = vector.broadcast %317 : vector<1x32xf32> to vector<16x32xf32>
    %319 = arith.addf %315, %318 : vector<16x32xf32>
    %320 = arith.addf %319, %301 : vector<16x32xf32>
    %321 = arith.truncf %320 : vector<16x32xf32> to vector<16x32xbf16>
    %c0_139 = arith.constant 0 : index
    %c0_140 = arith.constant 0 : index
    %322 = vector.load %arg18[%c0_139, %c0_140] : memref<128x32xbf16, #tpu.memory_space<vmem>>, vector<128x32xbf16>
    %cst_141 = arith.constant dense<0.000000e+00> : vector<16x128xf32>
    %323 = tpu.matmul %321, %322, %cst_141 {dimension_numbers = #tpu.dot_dimension_numbers<[1], [1], [0], [0], [0, 0, 1, 0], [], []>} : vector<16x32xbf16>, vector<128x32xbf16>, vector<16x128xf32> -> vector<16x128xf32>
    %c0_142 = arith.constant 0 : index
    %c0_143 = arith.constant 0 : index
    %324 = vector.load %arg19[%c0_142, %c0_143] : memref<16x128xf32, #tpu.memory_space<vmem>>, vector<16x128xf32>
    tpu.vector_store %arg19[%c0_142, %c0_143], %323 {strides = array<i32>} : memref<16x128xf32, #tpu.memory_space<vmem>>, vector<16x128xf32>,
    return
  }
  func.func @transform_0(%arg0: i32) -> (i32, i32) {
    %c0_i32 = arith.constant 0 : i32
    %c0_i32_0 = arith.constant 0 : i32
    return %arg0, %c0_i32 : i32, i32
  }
  func.func @transform_1(%arg0: i32) -> (i32, i32, i32) {
    %c0_i32 = arith.constant 0 : i32
    %c0_i32_0 = arith.constant 0 : i32
    %c0_i32_1 = arith.constant 0 : i32
    %c0_i32_2 = arith.constant 0 : i32
    return %c0_i32, %c0_i32_0, %c0_i32_1 : i32, i32, i32
  }
  func.func @transform_2(%arg0: i32) -> (i32, i32, i32) {
    %c0_i32 = arith.constant 0 : i32
    %c0_i32_0 = arith.constant 0 : i32
    %c0_i32_1 = arith.constant 0 : i32
    %c0_i32_2 = arith.constant 0 : i32
    return %c0_i32, %c0_i32_0, %c0_i32_1 : i32, i32, i32
  }
  func.func @transform_3(%arg0: i32) -> (i32, i32, i32) {
    %c0_i32 = arith.constant 0 : i32
    %c0_i32_0 = arith.constant 0 : i32
    %c0_i32_1 = arith.constant 0 : i32
    %c0_i32_2 = arith.constant 0 : i32
    return %c0_i32, %c0_i32_0, %c0_i32_1 : i32, i32, i32
  }
  func.func @transform_4(%arg0: i32) -> (i32, i32, i32) {
    %c0_i32 = arith.constant 0 : i32
    %c0_i32_0 = arith.constant 0 : i32
    %c0_i32_1 = arith.constant 0 : i32
    %c0_i32_2 = arith.constant 0 : i32
    return %c0_i32, %c0_i32_0, %c0_i32_1 : i32, i32, i32
  }
  func.func @transform_5(%arg0: i32) -> (i32, i32, i32) {
    %c0_i32 = arith.constant 0 : i32
    %c0_i32_0 = arith.constant 0 : i32
    %c0_i32_1 = arith.constant 0 : i32
    %c0_i32_2 = arith.constant 0 : i32
    return %c0_i32, %c0_i32_0, %c0_i32_1 : i32, i32, i32
  }
  func.func @transform_6(%arg0: i32) -> (i32, i32, i32) {
    %c0_i32 = arith.constant 0 : i32
    %c0_i32_0 = arith.constant 0 : i32
    %c0_i32_1 = arith.constant 0 : i32
    %c0_i32_2 = arith.constant 0 : i32
    return %c0_i32, %c0_i32_0, %c0_i32_1 : i32, i32, i32
  }
  func.func @transform_7(%arg0: i32) -> (i32, i32, i32) {
    %c0_i32 = arith.constant 0 : i32
    %c0_i32_0 = arith.constant 0 : i32
    %c0_i32_1 = arith.constant 0 : i32
    %c0_i32_2 = arith.constant 0 : i32
    return %c0_i32, %c0_i32_0, %c0_i32_1 : i32, i32, i32
  }
  func.func @transform_8(%arg0: i32) -> (i32, i32, i32) {
    %c0_i32 = arith.constant 0 : i32
    %c0_i32_0 = arith.constant 0 : i32
    %c0_i32_1 = arith.constant 0 : i32
    %c0_i32_2 = arith.constant 0 : i32
    return %c0_i32, %c0_i32_0, %c0_i32_1 : i32, i32, i32
  }
  func.func @transform_9(%arg0: i32) -> (i32, i32, i32) {
    %c0_i32 = arith.constant 0 : i32
    %c0_i32_0 = arith.constant 0 : i32
    %c0_i32_1 = arith.constant 0 : i32
    %c0_i32_2 = arith.constant 0 : i32
    return %c0_i32, %c0_i32_0, %c0_i32_1 : i32, i32, i32
  }
  func.func @transform_10(%arg0: i32) -> (i32, i32, i32) {
    %c0_i32 = arith.constant 0 : i32
    %c0_i32_0 = arith.constant 0 : i32
    %c0_i32_1 = arith.constant 0 : i32
    %c0_i32_2 = arith.constant 0 : i32
    return %c0_i32, %c0_i32_0, %c0_i32_1 : i32, i32, i32
  }
  func.func @transform_11(%arg0: i32) -> (i32, i32, i32) {
    %c0_i32 = arith.constant 0 : i32
    %c0_i32_0 = arith.constant 0 : i32
    %c0_i32_1 = arith.constant 0 : i32
    %c0_i32_2 = arith.constant 0 : i32
    return %c0_i32, %c0_i32_0, %c0_i32_1 : i32, i32, i32
  }
  func.func @transform_12(%arg0: i32) -> (i32, i32, i32) {
    %c0_i32 = arith.constant 0 : i32
    %c0_i32_0 = arith.constant 0 : i32
    %c0_i32_1 = arith.constant 0 : i32
    %c0_i32_2 = arith.constant 0 : i32
    return %c0_i32, %c0_i32_0, %c0_i32_1 : i32, i32, i32
  }
  func.func @transform_13(%arg0: i32) -> (i32, i32, i32) {
    %c0_i32 = arith.constant 0 : i32
    %c0_i32_0 = arith.constant 0 : i32
    %c0_i32_1 = arith.constant 0 : i32
    %c0_i32_2 = arith.constant 0 : i32
    return %c0_i32, %c0_i32_0, %c0_i32_1 : i32, i32, i32
  }
  func.func @transform_14(%arg0: i32) -> (i32, i32, i32) {
    %c0_i32 = arith.constant 0 : i32
    %c0_i32_0 = arith.constant 0 : i32
    %c0_i32_1 = arith.constant 0 : i32
    %c0_i32_2 = arith.constant 0 : i32
    return %c0_i32, %c0_i32_0, %c0_i32_1 : i32, i32, i32
  }
  func.func @transform_15(%arg0: i32) -> (i32, i32, i32) {
    %c0_i32 = arith.constant 0 : i32
    %c0_i32_0 = arith.constant 0 : i32
    %c0_i32_1 = arith.constant 0 : i32
    %c0_i32_2 = arith.constant 0 : i32
    return %c0_i32, %c0_i32_0, %c0_i32_1 : i32, i32, i32
  }
  func.func @transform_16(%arg0: i32) -> (i32, i32, i32) {
    %c0_i32 = arith.constant 0 : i32
    %c0_i32_0 = arith.constant 0 : i32
    %c0_i32_1 = arith.constant 0 : i32
    %c0_i32_2 = arith.constant 0 : i32
    return %c0_i32, %c0_i32_0, %c0_i32_1 : i32, i32, i32
  }
  func.func @transform_17(%arg0: i32) -> (i32, i32) {
    %c0_i32 = arith.constant 0 : i32
    %c0_i32_0 = arith.constant 0 : i32
    %c0_i32_1 = arith.constant 0 : i32
    return %c0_i32, %c0_i32_0 : i32, i32
  }
  func.func @transform_18(%arg0: i32) -> (i32, i32) {
    %c0_i32 = arith.constant 0 : i32
    %c0_i32_0 = arith.constant 0 : i32
    return %arg0, %c0_i32 : i32, i32
  }
}

</mosaic_0001>

<bundles_post_ra>
// kernel: transformer_with_lm_head.1
= control target key start
LH: loop header
LB: loop body
LE: loop exit
PB: predicated region body
PF: predicated region fallthrough
CT: control target
= control target key end

     0   :  { %s4732_s0 = inlined_call_operand.vmem [shape: f32[16,32], index: 0, kind: input, shape index: {}]   ;;  %s4733_s1 = inlined_call_operand.vmem [shape: f32[2,1,32], index: 1, kind: input, shape index: {}]   ;;  %s4734_s2 = inlined_call_operand.vmem [shape: f32[2,1,32], index: 2, kind: input, shape index: {}]   ;;  %s4735_s3 = inlined_call_operand.vmem [shape: bf16[2,32,32], index: 3, kind: input, shape index: {}]   ;;  %s4736_s4 = inlined_call_operand.vmem [shape: bf16[2,32,32], index: 4, kind: input, shape index: {}]   ;;  %s4737_s5 = inlined_call_operand.vmem [shape: bf16[2,32,32], index: 5, kind: input, shape index: {}]   ;;  %s4738_s6 = inlined_call_operand.vmem [shape: f32[2,1,32], index: 6, kind: input, shape index: {}]   ;;  %s4739_s7 = inlined_call_operand.vmem [shape: f32[2,1,32], index: 7, kind: input, shape index: {}]   ;;  %s4740_s8 = inlined_call_operand.vmem [shape: f32[2,1,32], index: 8, kind: input, shape index: {}]   ;;  %s4741_s9 = inlined_call_operand.vmem [shape: bf16[2,32,32], index: 9, kind: input, shape index: {}]   ;;  %s4742_s10 = inlined_call_operand.vmem [shape: f32[2,1,32], index: 10, kind: input, shape index: {}]   ;;  %s4743_s11 = inlined_call_operand.vmem [shape: f32[2,1,32], index: 11, kind: input, shape index: {}]   ;;  %s4744_s12 = inlined_call_operand.vmem [shape: f32[2,1,32], index: 12, kind: input, shape index: {}]   ;;  %s4745_s13 = inlined_call_operand.vmem [shape: bf16[2,32,64], index: 13, kind: input, shape index: {}]   ;;  %s4746_s14 = inlined_call_operand.vmem [shape: f32[2,1,64], index: 14, kind: input, shape index: {}]   ;;  %s4747_s15 = inlined_call_operand.vmem [shape: bf16[2,64,32], index: 15, kind: input, shape index: {}]   ;;  %s4748_s16 = inlined_call_operand.vmem [shape: f32[2,1,32], index: 16, kind: input, shape index: {}]   ;;  %s4749_s17 = inlined_call_operand.vmem [shape: bf16[128,32], index: 17, kind: input, shape index: {}]   ;;  %s4750_s18 = inlined_call_operand.hbm [shape: f32[16,128], index: 18, kind: output, shape index: {}]  }
   0x1   :  { %4755 = sst [smem:[#allocation5_spill]] %s4732_s0 }
   0x2   :  { %4756 = sst [smem:[#allocation6_spill]] %s4733_s1 }
   0x3   :  { %4757 = sst [smem:[#allocation7_spill]] %s4734_s2 }
   0x4   :  { %s4758_s29 = sld [smem:[#allocation5_spill]]  ;;  %vm70_vm0 = vcmask 261120  }
   0xa   :  { %v61_v0 = vld [vmem:[%s4758_s29] sm:$0xff]  ;;  %v62_v1 = vld [vmem:[%s4758_s29 + $0x8] sm:$0xff] }
   0xb   :  { %v71_v2 = vsel %vm70_vm0, %v61_v0, 0.0  ;;  %v74_v3 = vsel %vm70_vm0, %v62_v1, 0.0 }
   0xc   :  { %72 = vadd.xlane.f32.xlu0 %v71_v2 }
  0x10   :  { %75 = vadd.xlane.f32.xlu0 %v74_v3 }
  0x11   :  { %23 = vsyncpa [#allocation3], 0  ;;  %v3862_v14 = vld [vmem:[%s4735_s3 + $0x8] sm:$0xff]   ;;  %v4000_v15 = vmov 0.0   ;;  %vm4001_vm1 = vmmov 0   ;;  %v3863_v16 = vld [vmem:[%s4735_s3] sm:$0xff]  }
  0x12   :  { %3416 = vmatprep.subr.bf16.mxu0 %v4000_v15  ;;  %3420 = vmatprep.mubr.msk.bf16.mxu0 %vm4001_vm1, %v4000_v15  ;;  %s4759_s23 = sld [smem:[#allocation6_spill]]  ;;  %v3864_v33 = vld [vmem:[%s4736_s4 + $0x8] sm:$0xff]   ;;  %v3865_v35 = vld [vmem:[%s4736_s4] sm:$0xff]   ;;  %s4002_s25 = smov 120   ;;  %vm394_vm2 = vcmask 64512   ;;  %vm872_vm3 = vcmask 1043456  }
  0x13   :  { %3417 = vmatpush3.bf16.msra.mxu0 %v3862_v14  ;;  %3440 = vmatprep.subr.bf16.mxu1 %v4000_v15  ;;  %s4760_s26 = sld [smem:[#allocation7_spill]]  ;;  %v3866_v36 = vld [vmem:[%s4737_s5 + $0x8] sm:$0xff]   ;;  %v3867_v37 = vld [vmem:[%s4737_s5] sm:$0xff]   ;;  %s4003_s27 = smov 112   ;;  %vm1264_vm5 = vcmask 130048   ;;  %vm1267_vm6 = vcmask 195584  }
  0x14   :  { %3418 = vmatprep.subr.bf16.mxu0 %v4000_v15  ;;  %3442 = vmatprep.mubr.msk.bf16.mxu1 %vm4001_vm1, %v4000_v15  ;;  %v3166_v39 = vld [vmem:[%s4738_s6] ss:$0 sm:$0xff]  ;;  %s4004_s30 = smov 104   ;;  %s4005_s1 = smov 8   ;;  %vm1494_vm7 = vcmask 523264  }
  0x15   :  { %v3170_v45 = vld [vmem:[%s4739_s7] ss:$0 sm:$0xff]  ;;  %s4006_s20 = smov 16   ;;  %s4754_s2 = smov 24  }
  0x16   :  { %v3174_v59 = vld [vmem:[%s4740_s8] ss:$0 sm:$0xff] }
  0x17   :  { %3419 = vmatpush3.bf16.msra.mxu0 %v3863_v16 }
  0x18   :  { %3424 = vmatprep.subr.bf16.mxu0 %v4000_v15  ;;  %v3164_v25 = vld [vmem:[%s4759_s23] ss:$0 sm:$0xff] }
  0x19   :  { %v3165_v29 = vld [vmem:[%s4760_s26] ss:$0 sm:$0xff] }
  0x95   :  { %v73_v4 = vpop.xlane.xlu0 %72 }
  0x96   :  { %v78_v5 = vmul.f32 0.03125, %v73_v4 }
  0x98   :  { %v80_v6 = vsub.f32 %v61_v0, %v78_v5 }
  0x99   :  { %v76_v7 = vpop.xlane.xlu0 %75 }
  0x9a   :  { %v79_v8 = vmul.f32 0.03125, %v76_v7  ;;  %v82_v9 = vmul.f32 %v80_v6, %v80_v6 }
  0x9c   :  { %v81_v10 = vsub.f32 %v62_v1, %v79_v8  ;;  %v84_v11 = vsel %vm70_vm0, %v82_v9, 0.0 }
  0x9d   :  { %85 = vadd.xlane.f32.xlu1 %v84_v11 }
  0x9e   :  { %v83_v12 = vmul.f32 %v81_v10, %v81_v10 }
  0xa0   :  { %v87_v13 = vsel %vm70_vm0, %v83_v12, 0.0 }
  0xa1   :  { %88 = vadd.xlane.f32.xlu1 %v87_v13 }
 0x126   :  { %v86_v17 = vpop.xlane.xlu1 %85 }
 0x127   :  { %v90_v18 = vmul.f32 0.03125, %v86_v17 }
 0x129   :  { %v92_v19 = vadd.f32 1e-12, %v90_v18 }
 0x12a   :  { %v89_v20 = vpop.xlane.xlu1 %88 }
 0x12b   :  { %3898 = vrsqrt.f32 %v92_v19  ;;  %v91_v21 = vmul.f32 0.03125, %v89_v20 }
 0x12d   :  { %v93_v22 = vadd.f32 1e-12, %v91_v21 }
 0x12f   :  { %3900 = vrsqrt.f32 %v93_v22 }
 0x138   :  { %v3899_v23 = vpop.eup %3898 }
 0x139   :  { %v96_v24 = vmul.f32 %v3899_v23, %v80_v6 }
 0x13b   :  { %v104_v28 = vmul.f32 %v3164_v25, %v96_v24 }
 0x13c   :  { %v3901_v26 = vpop.eup %3900 }
 0x13d   :  { %v97_v27 = vmul.f32 %v3901_v26, %v81_v10  ;;  %v4135_v31 = vadd.f32 %v3165_v29, %v104_v28 }
 0x13f   :  { %v105_v30 = vmul.f32 %v3164_v25, %v97_v27 }
 0x141   :  { %v4137_v32 = vadd.f32 %v3165_v29, %v105_v30 }
 0x143   :  { %v114_v34 = vpack.c.bf16 %v4137_v32, %v4135_v31 }
 0x145   :  { %3421 = vmatmul.mubr.msk.bf16.vlgmr.msra.gmra.mxu0 %vm70_vm0, %v114_v34 }
 0x146   :  { %3425 = vmatpush3.bf16.msra.mxu0 %v3864_v33  ;;  %3428 = vmatprep.mubr.msk.bf16.mxu0 %vm4001_vm1, %v4000_v15 }
 0x147   :  { %3426 = vmatprep.subr.bf16.mxu0 %v4000_v15 }
 0x14a   :  { %3427 = vmatpush3.bf16.msra.mxu0 %v3865_v35 }
 0x14b   :  { %3432 = vmatprep.subr.bf16.mxu0 %v4000_v15 }
 0x14d   :  { %3429 = vmatmul.mubr.msk.bf16.vlgmr.msra.gmra.mxu0 %vm70_vm0, %v114_v34 }
 0x14e   :  { %3433 = vmatpush3.bf16.msra.mxu0 %v3866_v36  ;;  %3436 = vmatprep.mubr.msk.bf16.mxu0 %vm4001_vm1, %v4000_v15 }
 0x14f   :  { %3434 = vmatprep.subr.bf16.mxu0 %v4000_v15 }
 0x152   :  { %3435 = vmatpush3.bf16.msra.mxu0 %v3867_v37 }
 0x153   :  { %3446 = vmatprep.subr.bf16.mxu0 %v4000_v15 }
 0x155   :  { %3437 = vmatmul.mubr.msk.bf16.vlgmr.msra.gmra.mxu0 %vm70_vm0, %v114_v34 }
 0x156   :  { %3448 = vmatprep.mubr.msk.bf16.mxu0 %vm4001_vm1, %v4000_v15 }
 0x205   :  { %v175_v38 = vpop.f32.mrf.mxu0 }
 0x206   :  { %v176_v42 = vadd.f32 %v3166_v39, %v175_v38 }
 0x207   :  { %v3422_v40 = vpop.f32.mrf.mxu0 }
 0x208   :  { %v330_v61 = vpack.c.bf16 %v176_v42, %v176_v42 }
 0x209   :  { %v178_v41 = vpop.f32.mrf.mxu0 }
 0x20a   :  { %v179_v43 = vadd.f32 %v3166_v39, %v178_v41 }
 0x20b   :  { %v3423_v44 = vpop.f32.mrf.mxu0 }
 0x20c   :  { %v3747_v46 = vpack.i.bf16 %v179_v43, %v176_v42  ;;  %v331_v1 = vpack.c.bf16 %v179_v43, %v179_v43 }
 0x20d   :  { %v239_v47 = vpop.f32.mrf.mxu0 }
 0x20e   :  { %v240_v48 = vadd.f32 %v3170_v45, %v239_v47  ;;  %3748 = vrot.lane.b32.xlu1 %v3747_v46, %s4002_s25  ;;  %v63_v47 = vlaneseq }
 0x20f   :  { %v3430_v49 = vpop.f32.mrf.mxu0 }
 0x210   :  { %v358_v50 = vpack.c.bf16 %v240_v48, %v240_v48  ;;  %v66_v49 = vand.u32 127, %v63_v47 }
 0x211   :  { %v242_v51 = vpop.f32.mrf.mxu0 }
 0x212   :  { %v243_v52 = vadd.f32 %v3170_v45, %v242_v51  ;;  %v399_v53 = vsel %vm394_vm2, %v358_v50, 0 }
 0x213   :  { %v3431_v54 = vpop.f32.mrf.mxu0  ;;  %3441 = vmatpush3.bf16.xpose.msra.mxu1 %v399_v53 }
 0x214   :  { %v3752_v55 = vpack.i.bf16 %v243_v52, %v240_v48  ;;  %v359_v56 = vpack.c.bf16 %v243_v52, %v243_v52  ;;  %3452 = vmatprep.subr.bf16.mxu1 %v4000_v15  ;;  %v64_v48 = vshrl.u32 %v63_v47, 7 }
 0x215   :  { %v303_v57 = vpop.f32.mrf.mxu0 }
 0x216   :  { %3753 = vrot.lane.b32.xlu1 %v3752_v55, %s4003_s27  ;;  %3743 = vrot.lane.b32.xlu0 %v3752_v55, %s4002_s25  ;;  %v445_v58 = vsel %vm394_vm2, %v359_v56, 0  ;;  %v4182_v63 = vadd.f32 %v3174_v59, %v303_v57  ;;  %vm4237_vm4 = vcmp.le.s32.totalorder %v66_v49, %v64_v48 }
 0x217   :  { %v3438_v60 = vpop.f32.mrf.mxu0  ;;  %3447 = vmatpush3.bf16.xpose.msra.mxu0 %v445_v58 }
 0x218   :  { %3458 = vmatprep.subr.bf16.mxu0 %v4000_v15  ;;  %v386_v41 = vpack.c.bf16 %v4182_v63, %v4182_v63 }
 0x219   :  { %v306_v62 = vpop.f32.mrf.mxu0 }
 0x21a   :  { %v4184_v0 = vadd.f32 %v3174_v59, %v306_v62  ;;  %3443 = vmatmul.mubr.msk.bf16.vlgmr.msra.gmra.mxu1 %vm394_vm2, %v330_v61  ;;  %3758 = vrot.lane.b32.xlu1 %v3747_v46, %s4003_s27  ;;  %v874_v45 = vsel %vm872_vm3, %v386_v41, 0 }
 0x21b   :  { %3763 = vrot.lane.b32.xlu0 %v3752_v55, %s4004_s30  ;;  %v3439_v2 = vpop.f32.mrf.mxu0  ;;  %3454 = vmatprep.mubr.msk.bf16.mxu1 %vm4001_vm1, %v4000_v15 }
 0x21c   :  { %v4193_v3 = vpack.i.bf16 %v4184_v0, %v4182_v63  ;;  %v387_v42 = vpack.c.bf16 %v4184_v0, %v4184_v0 }
 0x21e   :  { %3768 = vrot.lane.b32.xlu1 %v3747_v46, %s4004_s30  ;;  %3449 = vmatmul.mubr.msk.bf16.vlgmr.msra.gmra.mxu0 %vm394_vm2, %v331_v1  ;;  %v920_v46 = vsel %vm872_vm3, %v387_v42, 0 }
 0x21f   :  { %3460 = vmatprep.mubr.msk.bf16.mxu0 %vm4001_vm1, %v4000_v15 }
 0x280   :  { %v3749_v4 = vpop.permute.xlu1 %3748 }
 0x281   :  { %v3751_v16 = vunpack.i.h.bf16 %v3749_v4  ;;  %v3750_v17 = vunpack.i.l.bf16 %v3749_v4 }
 0x283   :  { %v333_v21 = vpack.c.bf16 %v3751_v16, %v3751_v16  ;;  %v332_v22 = vpack.c.bf16 %v3750_v17, %v3750_v17 }
 0x288   :  { %v3744_v5 = vpop.permute.xlu0 %3743  ;;  %v3754_v8 = vpop.permute.xlu1 %3753 }
 0x289   :  { %v3746_v6 = vunpack.i.h.bf16 %v3744_v5  ;;  %v3745_v7 = vunpack.i.l.bf16 %v3744_v5  ;;  %v3756_v11 = vunpack.i.h.bf16 %v3754_v8  ;;  %v3755_v12 = vunpack.i.l.bf16 %v3754_v8 }
 0x28b   :  { %v361_v9 = vpack.c.bf16 %v3746_v6, %v3746_v6  ;;  %v360_v10 = vpack.c.bf16 %v3745_v7, %v3745_v7  ;;  %v363_v18 = vpack.c.bf16 %v3756_v11, %v3756_v11  ;;  %v362_v19 = vpack.c.bf16 %v3755_v12, %v3755_v12 }
 0x28c   :  { %v3759_v23 = vpop.permute.xlu1 %3758 }
 0x28d   :  { %v491_v13 = vsel %vm394_vm2, %v360_v10, 0  ;;  %v537_v14 = vsel %vm394_vm2, %v361_v9, 0  ;;  %v3764_v20 = vpop.permute.xlu0 %3763  ;;  %v583_v26 = vsel %vm394_vm2, %v362_v19, 0  ;;  %v629_v27 = vsel %vm394_vm2, %v363_v18, 0 }
 0x28e   :  { %3453 = vmatpush3.bf16.xpose.msra.mxu1 %v491_v13  ;;  %3459 = vmatpush3.bf16.xpose.msra.mxu0 %v537_v14  ;;  %v3766_v24 = vunpack.i.h.bf16 %v3764_v20  ;;  %v3765_v25 = vunpack.i.l.bf16 %v3764_v20  ;;  %v3761_v28 = vunpack.i.h.bf16 %v3759_v23  ;;  %v3760_v29 = vunpack.i.l.bf16 %v3759_v23 }
 0x28f   :  { %3464 = vmatprep.subr.bf16.mxu1 %v4000_v15  ;;  %3470 = vmatprep.subr.bf16.mxu0 %v4000_v15 }
 0x290   :  { %v365_v30 = vpack.c.bf16 %v3766_v24, %v3766_v24  ;;  %v364_v33 = vpack.c.bf16 %v3765_v25, %v3765_v25  ;;  %v335_v34 = vpack.c.bf16 %v3761_v28, %v3761_v28  ;;  %v334_v35 = vpack.c.bf16 %v3760_v29, %v3760_v29  ;;  %v3769_v36 = vpop.permute.xlu1 %3768 }
 0x291   :  { %v3771_v39 = vunpack.i.h.bf16 %v3769_v36  ;;  %v3770_v40 = vunpack.i.l.bf16 %v3769_v36 }
 0x292   :  { %v675_v37 = vsel %vm394_vm2, %v364_v33, 0  ;;  %v721_v38 = vsel %vm394_vm2, %v365_v30, 0 }
 0x293   :  { %v337_v43 = vpack.c.bf16 %v3771_v39, %v3771_v39  ;;  %v336_v44 = vpack.c.bf16 %v3770_v40, %v3770_v40 }
 0x295   :  { %3455 = vmatmul.mubr.msk.bf16.vlgmr.msra.gmra.mxu1 %vm394_vm2, %v332_v22  ;;  %3461 = vmatmul.mubr.msk.bf16.vlgmr.msra.gmra.mxu0 %vm394_vm2, %v333_v21 }
 0x296   :  { %3465 = vmatpush3.bf16.xpose.msra.mxu1 %v583_v26  ;;  %3471 = vmatpush3.bf16.xpose.msra.mxu0 %v629_v27 }
 0x297   :  { %3466 = vmatprep.mubr.msk.bf16.mxu1 %vm4001_vm1, %v4000_v15  ;;  %3472 = vmatprep.mubr.msk.bf16.mxu0 %vm4001_vm1, %v4000_v15 }
 0x298   :  { %3476 = vmatprep.subr.bf16.mxu1 %v4000_v15  ;;  %3482 = vmatprep.subr.bf16.mxu0 %v4000_v15 }
 0x29d   :  { %3467 = vmatmul.mubr.msk.bf16.vlgmr.msra.gmra.mxu1 %vm394_vm2, %v334_v35  ;;  %3473 = vmatmul.mubr.msk.bf16.vlgmr.msra.gmra.mxu0 %vm394_vm2, %v335_v34 }
 0x29e   :  { %3477 = vmatpush3.bf16.xpose.msra.mxu1 %v675_v37  ;;  %3483 = vmatpush3.bf16.xpose.msra.mxu0 %v721_v38 }
 0x29f   :  { %3478 = vmatprep.mubr.msk.bf16.mxu1 %vm4001_vm1, %v4000_v15  ;;  %3484 = vmatprep.mubr.msk.bf16.mxu0 %vm4001_vm1, %v4000_v15 }
 0x2a0   :  { %3488 = vmatprep.subr.bf16.mxu1 %v4000_v15  ;;  %3494 = vmatprep.subr.bf16.mxu0 %v4000_v15 }
 0x2a5   :  { %3479 = vmatmul.mubr.msk.bf16.vlgmr.msra.gmra.mxu1 %vm394_vm2, %v336_v44  ;;  %3485 = vmatmul.mubr.msk.bf16.vlgmr.msra.gmra.mxu0 %vm394_vm2, %v337_v43 }
 0x2a6   :  { %3489 = vmatpush3.bf16.msra.mxu1 %v874_v45  ;;  %3495 = vmatpush3.bf16.msra.mxu0 %v920_v46 }
 0x2a7   :  { %3490 = vmatprep.mubr.msk.bf16.mxu1 %vm4001_vm1, %v4000_v15  ;;  %3496 = vmatprep.mubr.msk.bf16.mxu0 %vm4001_vm1, %v4000_v15 }
 0x2a8   :  { %3500 = vmatprep.subr.bf16.mxu1 %v4000_v15  ;;  %3506 = vmatprep.subr.bf16.mxu0 %v4000_v15 }
 0x2da   :  { %v435_v51 = vpop.f32.mrf.mxu1 }
 0x2db   :  { %v765_v52 = vsel %vm4237_vm4, %v435_v51, -1e+30 }
 0x2dc   :  { %v3444_v53 = vpop.f32.mrf.mxu1  ;;  %v773_v54 = vsel %vm394_vm2, %v765_v52, -inf }
 0x2dd   :  { %774 = vmax.xlane.f32.xlu0 %v773_v54 }
 0x2de   :  { %v438_v55 = vpop.f32.mrf.mxu1  ;;  %v481_v56 = vpop.f32.mrf.mxu0 }
 0x2df   :  { %v766_v57 = vsel %vm4237_vm4, %v481_v56, -1e+30 }
 0x2e0   :  { %v3445_v58 = vpop.f32.mrf.mxu1  ;;  %v3450_v59 = vpop.f32.mrf.mxu0  ;;  %v776_v60 = vsel %vm394_vm2, %v766_v57, -inf }
 0x2e1   :  { %777 = vmax.xlane.f32.xlu1 %v776_v60 }
 0x2e2   :  { %v484_v61 = vpop.f32.mrf.mxu0 }
 0x2e4   :  { %v3451_v62 = vpop.f32.mrf.mxu0 }
 0x355   :  { %v527_v63 = vpop.f32.mrf.mxu1  ;;  %v573_v0 = vpop.f32.mrf.mxu0 }
 0x356   :  { %v767_v1 = vsel %vm4237_vm4, %v527_v63, -1e+30  ;;  %v768_v6 = vsel %vm4237_vm4, %v573_v0, -1e+30 }
 0x357   :  { %v3456_v2 = vpop.f32.mrf.mxu1  ;;  %v3462_v4 = vpop.f32.mrf.mxu0  ;;  %v779_v5 = vsel %vm394_vm2, %v767_v1, -inf  ;;  %v782_v11 = vsel %vm394_vm2, %v768_v6, -inf }
 0x358   :  { %780 = vmax.xlane.f32.xlu0 %v779_v5 }
 0x359   :  { %v530_v7 = vpop.f32.mrf.mxu1  ;;  %v576_v8 = vpop.f32.mrf.mxu0 }
 0x35b   :  { %v3457_v9 = vpop.f32.mrf.mxu1  ;;  %v3463_v10 = vpop.f32.mrf.mxu0 }
 0x35c   :  { %783 = vmax.xlane.f32.xlu0 %v782_v11 }
 0x35d   :  { %v619_v12 = vpop.f32.mrf.mxu1  ;;  %v665_v13 = vpop.f32.mrf.mxu0 }
 0x35e   :  { %v769_v14 = vsel %vm4237_vm4, %v619_v12, -1e+30  ;;  %v770_v16 = vsel %vm4237_vm4, %v665_v13, -1e+30 }
 0x35f   :  { %v3468_v17 = vpop.f32.mrf.mxu1  ;;  %v3474_v18 = vpop.f32.mrf.mxu0  ;;  %v785_v19 = vsel %vm394_vm2, %v769_v14, -inf  ;;  %v788_v20 = vsel %vm394_vm2, %v770_v16, -inf }
 0x360   :  { %786 = vmax.xlane.f32.xlu0 %v785_v19  ;;  %789 = vmax.xlane.f32.xlu1 %v788_v20 }
 0x361   :  { %v622_v21 = vpop.f32.mrf.mxu1  ;;  %v668_v22 = vpop.f32.mrf.mxu0 }
 0x363   :  { %v3469_v23 = vpop.f32.mrf.mxu1  ;;  %v3475_v24 = vpop.f32.mrf.mxu0 }
 0x365   :  { %v711_v25 = vpop.f32.mrf.mxu1  ;;  %v757_v26 = vpop.f32.mrf.mxu0 }
 0x366   :  { %v771_v27 = vsel %vm4237_vm4, %v711_v25, -1e+30  ;;  %v4263_v28 = vsel %vm4237_vm4, %v757_v26, -1e+30  ;;  %v775_v29 = vpop.xlane.xlu0 %774 }
 0x367   :  { %v797_v30 = vsub.f32 %v765_v52, %v775_v29  ;;  %v3480_v33 = vpop.f32.mrf.mxu1  ;;  %v3486_v34 = vpop.f32.mrf.mxu0  ;;  %v791_v35 = vsel %vm394_vm2, %v771_v27, -inf  ;;  %v794_v36 = vsel %vm394_vm2, %v4263_v28, -inf }
 0x368   :  { %792 = vmax.xlane.f32.xlu0 %v791_v35  ;;  %795 = vmax.xlane.f32.xlu1 %v794_v36 }
 0x369   :  { %v805_v37 = vmul.f32 1.442695, %v797_v30  ;;  %v714_v38 = vpop.f32.mrf.mxu1  ;;  %v760_v39 = vpop.f32.mrf.mxu0 }
 0x36a   :  { %v778_v40 = vpop.xlane.xlu1 %777 }
 0x36b   :  { %3902 = vpow2.f32 %v805_v37  ;;  %v798_v41 = vsub.f32 %v766_v57, %v778_v40  ;;  %v3481_v42 = vpop.f32.mrf.mxu1  ;;  %v3487_v43 = vpop.f32.mrf.mxu0 }
 0x36d   :  { %v807_v44 = vmul.f32 1.442695, %v798_v41 }
 0x36f   :  { %3904 = vpow2.f32 %v807_v44 }
 0x378   :  { %v3903_v45 = vpop.eup %3902 }
 0x379   :  { %v821_v46 = vsel %vm394_vm2, %v3903_v45, 0.0 }
 0x37a   :  { %822 = vadd.xlane.f32.xlu0 %v821_v46 }
 0x37c   :  { %v3905_v47 = vpop.eup %3904 }
 0x37d   :  { %v824_v48 = vsel %vm394_vm2, %v3905_v47, 0.0 }
 0x37e   :  { %825 = vadd.xlane.f32.xlu1 %v824_v48 }
 0x3e1   :  { %v781_v49 = vpop.xlane.xlu0 %780 }
 0x3e2   :  { %v799_v51 = vsub.f32 %v767_v1, %v781_v49 }
 0x3e4   :  { %v809_v52 = vmul.f32 1.442695, %v799_v51 }
 0x3e5   :  { %v784_v53 = vpop.xlane.xlu0 %783 }
 0x3e6   :  { %3906 = vpow2.f32 %v809_v52  ;;  %v800_v54 = vsub.f32 %v768_v6, %v784_v53 }
 0x3e8   :  { %v811_v55 = vmul.f32 1.442695, %v800_v54 }
 0x3e9   :  { %v787_v56 = vpop.xlane.xlu0 %786  ;;  %v790_v57 = vpop.xlane.xlu1 %789 }
 0x3ea   :  { %3908 = vpow2.f32 %v811_v55  ;;  %v801_v58 = vsub.f32 %v769_v14, %v787_v56  ;;  %v802_v59 = vsub.f32 %v770_v16, %v790_v57 }
 0x3ec   :  { %v813_v60 = vmul.f32 1.442695, %v801_v58  ;;  %v815_v61 = vmul.f32 1.442695, %v802_v59 }
 0x3ee   :  { %3910 = vpow2.f32 %v813_v60 }
 0x3ef   :  { %3912 = vpow2.f32 %v815_v61 }
 0x3f1   :  { %v793_v62 = vpop.xlane.xlu0 %792  ;;  %v796_v11 = vpop.xlane.xlu1 %795 }
 0x3f2   :  { %v803_v63 = vsub.f32 %v771_v27, %v793_v62  ;;  %v804_v22 = vsub.f32 %v4263_v28, %v796_v11 }
 0x3f3   :  { %v3907_v0 = vpop.eup %3906 }
 0x3f4   :  { %v817_v2 = vmul.f32 1.442695, %v803_v63  ;;  %v827_v1 = vsel %vm394_vm2, %v3907_v0, 0.0  ;;  %v819_v23 = vmul.f32 1.442695, %v804_v22 }
 0x3f5   :  { %828 = vadd.xlane.f32.xlu0 %v827_v1 }
 0x3f6   :  { %3914 = vpow2.f32 %v817_v2 }
 0x3f7   :  { %v3909_v4 = vpop.eup %3908 }
 0x3f8   :  { %v830_v5 = vsel %vm394_vm2, %v3909_v4, 0.0 }
 0x3f9   :  { %831 = vadd.xlane.f32.xlu1 %v830_v5 }
 0x3fb   :  { %v4272_v6 = vpop.eup %3910 }
 0x3fc   :  { %v4274_v7 = vpop.eup %3912  ;;  %v833_v8 = vsel %vm394_vm2, %v4272_v6, 0.0 }
 0x3fd   :  { %834 = vadd.xlane.f32.xlu0 %v833_v8  ;;  %v836_v9 = vsel %vm394_vm2, %v4274_v7, 0.0 }
 0x3fe   :  { %837 = vadd.xlane.f32.xlu1 %v836_v9 }
 0x403   :  { %v4280_v10 = vpop.eup %3914  ;;  %v823_v12 = vpop.xlane.xlu0 %822 }
 0x404   :  { %3916 = vrcp.f32 %v823_v12  ;;  %v839_v13 = vsel %vm394_vm2, %v4280_v10, 0.0 }
 0x405   :  { %840 = vadd.xlane.f32.xlu0 %v839_v13 }
 0x407   :  { %v826_v14 = vpop.xlane.xlu1 %825 }
 0x408   :  { %3918 = vrcp.f32 %v826_v14 }
 0x409   :  { %3920 = vpow2.f32 %v819_v23 }
 0x40f   :  { %3778 = vrot.lane.b32.xlu1 %v4193_v3, %s4003_s27 }
 0x411   :  { %v3917_v16 = vpop.eup %3916 }
 0x412   :  { %v853_v17 = vmul.f32 %v3917_v16, %v3903_v45 }
 0x414   :  { %v861_v18 = vpack.c.bf16 %v853_v17, %v853_v17 }
 0x415   :  { %v3919_v19 = vpop.eup %3918 }
 0x416   :  { %3491 = vmatmul.mubr.msk.bf16.vlgmr.msra.gmra.mxu1 %vm394_vm2, %v861_v18  ;;  %v854_v20 = vmul.f32 %v3919_v19, %v3905_v47  ;;  %v4295_v24 = vpop.eup %3920 }
 0x417   :  { %3502 = vmatprep.mubr.msk.bf16.mxu1 %vm4001_vm1, %v4000_v15  ;;  %v842_v25 = vsel %vm394_vm2, %v4295_v24, 0.0 }
 0x418   :  { %v862_v21 = vpack.c.bf16 %v854_v20, %v854_v20 }
 0x41a   :  { %3497 = vmatmul.mubr.msk.bf16.vlgmr.msra.gmra.mxu0 %vm394_vm2, %v862_v21  ;;  %v3868_v21 = vld [vmem:[%s4741_s9 + $0x8] sm:$0xff]  }
 0x41b   :  { %3773 = vrot.lane.b32.xlu0 %v4193_v3, %s4002_s25  ;;  %3508 = vmatprep.mubr.msk.bf16.mxu0 %vm4001_vm1, %v4000_v15 }
 0x433   :  { %843 = vadd.xlane.f32.xlu1 %v842_v25 }
 0x444   :  { %3783 = vrot.lane.b32.xlu1 %v4193_v3, %s4004_s30 }
 0x47e   :  { %v829_v26 = vpop.xlane.xlu0 %828 }
 0x47f   :  { %3922 = vrcp.f32 %v829_v26 }
 0x482   :  { %v832_v27 = vpop.xlane.xlu1 %831 }
 0x483   :  { %3924 = vrcp.f32 %v832_v27 }
 0x486   :  { %v835_v28 = vpop.xlane.xlu0 %834 }
 0x487   :  { %v838_v29 = vpop.xlane.xlu1 %837  ;;  %3926 = vrcp.f32 %v835_v28 }
 0x488   :  { %3928 = vrcp.f32 %v838_v29 }
 0x48b   :  { %v3779_v33 = vpop.permute.xlu1 %3778 }
 0x48c   :  { %v3923_v34 = vpop.eup %3922  ;;  %v3781_v37 = vunpack.i.h.bf16 %v3779_v33  ;;  %v3780_v38 = vunpack.i.l.bf16 %v3779_v33 }
 0x48d   :  { %v855_v3 = vmul.f32 %v3923_v34, %v3907_v0 }
 0x48e   :  { %v841_v30 = vpop.xlane.xlu0 %840  ;;  %v391_v44 = vpack.c.bf16 %v3781_v37, %v3781_v37  ;;  %v390_v45 = vpack.c.bf16 %v3780_v38, %v3780_v38 }
 0x48f   :  { %v863_v49 = vpack.c.bf16 %v855_v3, %v855_v3  ;;  %3930 = vrcp.f32 %v841_v30 }
 0x490   :  { %v3925_v35 = vpop.eup %3924  ;;  %v1058_v53 = vsel %vm872_vm3, %v390_v45, 0  ;;  %v1104_v54 = vsel %vm872_vm3, %v391_v44, 0 }
 0x491   :  { %v856_v43 = vmul.f32 %v3925_v35, %v3909_v4 }
 0x492   :  { %v3774_v36 = vpop.permute.xlu0 %3773 }
 0x493   :  { %v3776_v39 = vunpack.i.h.bf16 %v3774_v36  ;;  %v3775_v40 = vunpack.i.l.bf16 %v3774_v36  ;;  %v864_v51 = vpack.c.bf16 %v856_v43, %v856_v43 }
 0x494   :  { %v3927_v48 = vpop.eup %3926 }
 0x495   :  { %v389_v41 = vpack.c.bf16 %v3776_v39, %v3776_v39  ;;  %v388_v42 = vpack.c.bf16 %v3775_v40, %v3775_v40  ;;  %v3929_v52 = vpop.eup %3928  ;;  %v857_v55 = vmul.f32 %v3927_v48, %v4272_v6  ;;  %v3869_v40 = vld [vmem:[%s4741_s9] sm:$0xff]  }
 0x496   :  { %v858_v56 = vmul.f32 %v3929_v52, %v4274_v7 }
 0x497   :  { %v966_v46 = vsel %vm872_vm3, %v388_v42, 0  ;;  %v1012_v47 = vsel %vm872_vm3, %v389_v41, 0  ;;  %v865_v57 = vpack.c.bf16 %v857_v55, %v857_v55 }
 0x498   :  { %3501 = vmatpush3.bf16.msra.mxu1 %v966_v46  ;;  %3507 = vmatpush3.bf16.msra.mxu0 %v1012_v47  ;;  %v866_v58 = vpack.c.bf16 %v858_v56, %v858_v56 }
 0x499   :  { %3512 = vmatprep.subr.bf16.mxu1 %v4000_v15  ;;  %3518 = vmatprep.subr.bf16.mxu0 %v4000_v15 }
 0x49b   :  { %3503 = vmatmul.mubr.msk.bf16.vlgmr.msra.gmra.mxu1 %vm394_vm2, %v863_v49  ;;  %3509 = vmatmul.mubr.msk.bf16.vlgmr.msra.gmra.mxu0 %vm394_vm2, %v864_v51 }
 0x49c   :  { %3513 = vmatpush3.bf16.msra.mxu1 %v1058_v53  ;;  %3519 = vmatpush3.bf16.msra.mxu0 %v1104_v54  ;;  %v3931_v60 = vpop.eup %3930 }
 0x49d   :  { %3514 = vmatprep.mubr.msk.bf16.mxu1 %vm4001_vm1, %v4000_v15  ;;  %3520 = vmatprep.mubr.msk.bf16.mxu0 %vm4001_vm1, %v4000_v15  ;;  %v859_v1 = vmul.f32 %v3931_v60, %v4280_v10 }
 0x49e   :  { %3524 = vmatprep.subr.bf16.mxu1 %v4000_v15  ;;  %3530 = vmatprep.subr.bf16.mxu0 %v4000_v15 }
 0x49f   :  { %v867_v6 = vpack.c.bf16 %v859_v1, %v859_v1  ;;  %v3194_v1 = vld [vmem:[%s4742_s10] ss:$0 sm:$0xff] }
 0x4a3   :  { %3515 = vmatmul.mubr.msk.bf16.vlgmr.msra.gmra.mxu1 %vm394_vm2, %v865_v57  ;;  %3521 = vmatmul.mubr.msk.bf16.vlgmr.msra.gmra.mxu0 %vm394_vm2, %v866_v58 }
 0x4a4   :  { %3526 = vmatprep.mubr.msk.bf16.mxu1 %vm4001_vm1, %v4000_v15  ;;  %3532 = vmatprep.mubr.msk.bf16.mxu0 %vm4001_vm1, %v4000_v15 }
 0x4bc   :  { %v844_v59 = vpop.xlane.xlu1 %843 }
 0x4bd   :  { %3932 = vrcp.f32 %v844_v59 }
 0x4c0   :  { %v3784_v61 = vpop.permute.xlu1 %3783 }
 0x4c1   :  { %v3786_v62 = vunpack.i.h.bf16 %v3784_v61  ;;  %v3785_v63 = vunpack.i.l.bf16 %v3784_v61 }
 0x4c3   :  { %v393_v0 = vpack.c.bf16 %v3786_v62, %v3786_v62  ;;  %v392_v2 = vpack.c.bf16 %v3785_v63, %v3785_v63 }
 0x4c5   :  { %v1150_v4 = vsel %vm872_vm3, %v392_v2, 0  ;;  %v1196_v5 = vsel %vm872_vm3, %v393_v0, 0 }
 0x4c6   :  { %3525 = vmatpush3.bf16.msra.mxu1 %v1150_v4  ;;  %3531 = vmatpush3.bf16.msra.mxu0 %v1196_v5 }
 0x4c7   :  { %3536 = vmatprep.subr.bf16.mxu1 %v4000_v15  ;;  %3544 = vmatprep.subr.bf16.mxu0 %v4000_v15 }
 0x4c9   :  { %3527 = vmatmul.mubr.msk.bf16.vlgmr.msra.gmra.mxu1 %vm394_vm2, %v867_v6 }
 0x4ca   :  { %v3933_v7 = vpop.eup %3932  ;;  %3540 = vmatprep.mubr.msk.bf16.mxu1 %vm4001_vm1, %v4000_v15  ;;  %3537 = vmatpush3.bf16.msra.mxu1 %v3868_v21 }
 0x4cb   :  { %v860_v8 = vmul.f32 %v3933_v7, %v4295_v24  ;;  %3538 = vmatprep.subr.bf16.mxu1 %v4000_v15 }
 0x4cd   :  { %v868_v9 = vpack.c.bf16 %v860_v8, %v860_v8 }
 0x4ce   :  { %3539 = vmatpush3.bf16.msra.mxu1 %v3869_v40 }
 0x4cf   :  { %3533 = vmatmul.mubr.msk.bf16.vlgmr.msra.gmra.mxu0 %vm394_vm2, %v868_v9  ;;  %3580 = vmatprep.subr.bf16.mxu1 %v4000_v15 }
 0x4d0   :  { %3548 = vmatprep.mubr.msk.bf16.mxu0 %vm4001_vm1, %v4000_v15 }
 0x4d6   :  { %v910_v10 = vpop.f32.mrf.mxu1 }
 0x4d8   :  { %v3492_v11 = vpop.f32.mrf.mxu1 }
 0x4da   :  { %v913_v12 = vpop.f32.mrf.mxu1  ;;  %v956_v13 = vpop.f32.mrf.mxu0 }
 0x4dc   :  { %v3493_v14 = vpop.f32.mrf.mxu1  ;;  %v3498_v16 = vpop.f32.mrf.mxu0 }
 0x4de   :  { %v959_v17 = vpop.f32.mrf.mxu0 }
 0x4e0   :  { %v3499_v18 = vpop.f32.mrf.mxu0 }
 0x55b   :  { %v1002_v19 = vpop.f32.mrf.mxu1  ;;  %v1048_v20 = vpop.f32.mrf.mxu0 }
 0x55c   :  { %v3787_v22 = vpack.i.bf16 %v1048_v20, %v1002_v19 }
 0x55d   :  { %v3504_v23 = vpop.f32.mrf.mxu1  ;;  %v3510_v24 = vpop.f32.mrf.mxu0 }
 0x55e   :  { %3788 = vrot.lane.b32.xlu1 %v3787_v22, %s4005_s1  ;;  %v3871_v24 = vld [vmem:[%s4745_s13] sm:$0xff]  }
 0x55f   :  { %v1005_v25 = vpop.f32.mrf.mxu1  ;;  %v1051_v26 = vpop.f32.mrf.mxu0 }
 0x561   :  { %v3505_v27 = vpop.f32.mrf.mxu1  ;;  %v3511_v28 = vpop.f32.mrf.mxu0 }
 0x563   :  { %v1094_v29 = vpop.f32.mrf.mxu1  ;;  %v1140_v30 = vpop.f32.mrf.mxu0 }
 0x564   :  { %v3792_v33 = vpack.i.bf16 %v1140_v30, %v1094_v29 }
 0x565   :  { %v3516_v34 = vpop.f32.mrf.mxu1  ;;  %v3522_v35 = vpop.f32.mrf.mxu0 }
 0x566   :  { %3793 = vrot.lane.b32.xlu0 %v3792_v33, %s4006_s20  ;;  %v3198_v35 = vld [vmem:[%s4743_s11] ss:$0 sm:$0xff] }
 0x567   :  { %v1097_v36 = vpop.f32.mrf.mxu1  ;;  %v1143_v37 = vpop.f32.mrf.mxu0 }
 0x569   :  { %v3517_v38 = vpop.f32.mrf.mxu1  ;;  %v3523_v39 = vpop.f32.mrf.mxu0 }
 0x56a   :  { %v3199_v39 = vld [vmem:[%s4744_s12] ss:$0 sm:$0xff] }
 0x589   :  { %v1186_v41 = vpop.f32.mrf.mxu1 }
 0x58b   :  { %v3528_v42 = vpop.f32.mrf.mxu1 }
 0x58d   :  { %v1189_v3 = vpop.f32.mrf.mxu1 }
 0x58e   :  { %v3872_v3 = vld [vmem:[%s4747_s15 + $0x18] sm:$0xff]  }
 0x58f   :  { %v3529_v43 = vpop.f32.mrf.mxu1  ;;  %v1232_v44 = vpop.f32.mrf.mxu0 }
 0x590   :  { %v3797_v45 = vpack.i.bf16 %v1232_v44, %v1186_v41  ;;  %v3873_v44 = vld [vmem:[%s4747_s15 + $0x10] sm:$0xff]  }
 0x591   :  { %v3534_v46 = vpop.f32.mrf.mxu0 }
 0x592   :  { %3798 = vrot.lane.b32.xlu1 %v3797_v45, %s4754_s2  ;;  %v3874_v45 = vld [vmem:[%s4747_s15 + $0x8] sm:$0xff]   ;;  %v3875_v46 = vld [vmem:[%s4747_s15] sm:$0xff]  }
 0x593   :  { %v1235_v47 = vpop.f32.mrf.mxu0 }
 0x594   :  { %v3200_v47 = vld [vmem:[%s4746_s14] ss:$0 sm:$0xff] }
 0x595   :  { %v3535_v48 = vpop.f32.mrf.mxu0 }
 0x5d0   :  { %v3789_v49 = vpop.permute.xlu1 %3788 }
 0x5d1   :  { %v3791_v52 = vunpack.i.h.bf16 %v3789_v49  ;;  %v3790_v53 = vunpack.i.l.bf16 %v3789_v49 }
 0x5d3   :  { %v1263_v57 = vsel %vm394_vm2, %v956_v13, %v3791_v52  ;;  %v1262_v58 = vsel %vm394_vm2, %v910_v10, %v3790_v53 }
 0x5d8   :  { %v3794_v51 = vpop.permute.xlu0 %3793 }
 0x5d9   :  { %v3796_v54 = vunpack.i.h.bf16 %v3794_v51  ;;  %v3795_v55 = vunpack.i.l.bf16 %v3794_v51 }
 0x5db   :  { %v1266_v61 = vsel %vm1264_vm5, %v1263_v57, %v3796_v54  ;;  %v1265_v62 = vsel %vm1264_vm5, %v1262_v58, %v3795_v55  ;;  %v3204_v58 = vld [vmem:[%s4748_s16] ss:$0 sm:$0xff] }
 0x604   :  { %v3799_v56 = vpop.permute.xlu1 %3798 }
 0x605   :  { %v3801_v59 = vunpack.i.h.bf16 %v3799_v56  ;;  %v3800_v60 = vunpack.i.l.bf16 %v3799_v56 }
 0x607   :  { %v1269_v63 = vsel %vm1267_vm6, %v1266_v61, %v3801_v59  ;;  %v1268_v0 = vsel %vm1267_vm6, %v1265_v62, %v3800_v60 }
 0x608   :  { %v1274_v2 = vpack.c.bf16 %v1269_v63, %v1268_v0 }
 0x60a   :  { %3541 = vmatmul.mubr.msk.bf16.vlgmr.msra.gmra.mxu1 %vm70_vm0, %v1274_v2 }
 0x60b   :  { %3584 = vmatprep.mubr.msk.bf16.mxu1 %vm4001_vm1, %v4000_v15 }
 0x6ca   :  { %v1331_v4 = vpop.f32.mrf.mxu1 }
 0x6cb   :  { %v1332_v5 = vadd.f32 %v3194_v1, %v1331_v4 }
 0x6cc   :  { %v3542_v6 = vpop.f32.mrf.mxu1 }
 0x6cd   :  { %v1338_v7 = vadd.f32 %v1332_v5, %v4135_v31 }
 0x6ce   :  { %v1334_v8 = vpop.f32.mrf.mxu1 }
 0x6cf   :  { %v1335_v9 = vadd.f32 %v3194_v1, %v1334_v8  ;;  %v1342_v10 = vsel %vm70_vm0, %v1338_v7, 0.0 }
 0x6d0   :  { %1343 = vadd.xlane.f32.xlu0 %v1342_v10  ;;  %v3543_v11 = vpop.f32.mrf.mxu1 }
 0x6d1   :  { %v1339_v12 = vadd.f32 %v1335_v9, %v4137_v32  ;;  %v3870_v32 = vld [vmem:[%s4745_s13 + $0x8] sm:$0xff]  }
 0x6d2   :  { %3545 = vmatpush3.bf16.msra.mxu0 %v3870_v32 }
 0x6d3   :  { %v1345_v13 = vsel %vm70_vm0, %v1339_v12, 0.0  ;;  %3546 = vmatprep.subr.bf16.mxu0 %v4000_v15 }
 0x6d4   :  { %1346 = vadd.xlane.f32.xlu1 %v1345_v13 }
 0x6d6   :  { %3547 = vmatpush3.bf16.msra.mxu0 %v3871_v24 }
 0x6d7   :  { %3552 = vmatprep.subr.bf16.mxu0 %v4000_v15 }
 0x759   :  { %v1344_v14 = vpop.xlane.xlu0 %1343 }
 0x75a   :  { %v1348_v16 = vmul.f32 0.03125, %v1344_v14 }
 0x75c   :  { %v1350_v17 = vsub.f32 %v1338_v7, %v1348_v16 }
 0x75d   :  { %v1347_v18 = vpop.xlane.xlu1 %1346 }
 0x75e   :  { %v1349_v19 = vmul.f32 0.03125, %v1347_v18  ;;  %v1352_v20 = vmul.f32 %v1350_v17, %v1350_v17  ;;  %v3877_v18 = vld [vmem:[%s4737_s5 + $0x18] sm:$0xff]  }
 0x75f   :  { %3581 = vmatpush3.bf16.msra.mxu1 %v3877_v18 }
 0x760   :  { %v1351_v21 = vsub.f32 %v1339_v12, %v1349_v19  ;;  %v1354_v31 = vsel %vm70_vm0, %v1352_v20, 0.0  ;;  %v3878_v19 = vld [vmem:[%s4735_s3 + $0x10] sm:$0xff]   ;;  %3582 = vmatprep.subr.bf16.mxu1 %v4000_v15 }
 0x761   :  { %1355 = vadd.xlane.f32.xlu0 %v1354_v31  ;;  %v3879_v20 = vld [vmem:[%s4737_s5 + $0x10] sm:$0xff]  }
 0x762   :  { %v1353_v22 = vmul.f32 %v1351_v21, %v1351_v21 }
 0x763   :  { %3583 = vmatpush3.bf16.msra.mxu1 %v3879_v20 }
 0x764   :  { %v1357_v23 = vsel %vm70_vm0, %v1353_v22, 0.0  ;;  %3594 = vmatprep.subr.bf16.mxu1 %v4000_v15 }
 0x765   :  { %1358 = vadd.xlane.f32.xlu0 %v1357_v23 }
 0x7ea   :  { %v1356_v25 = vpop.xlane.xlu0 %1355 }
 0x7eb   :  { %v1360_v26 = vmul.f32 0.03125, %v1356_v25 }
 0x7ed   :  { %v1362_v27 = vadd.f32 1e-12, %v1360_v26 }
 0x7ee   :  { %v1359_v28 = vpop.xlane.xlu0 %1358 }
 0x7ef   :  { %3934 = vrsqrt.f32 %v1362_v27  ;;  %v1361_v29 = vmul.f32 0.03125, %v1359_v28  ;;  %v3212_v27 = vld [vmem:[%s4759_s23 + $0x1] ss:$0 sm:$0xff] }
 0x7f1   :  { %v1363_v30 = vadd.f32 1e-12, %v1361_v29 }
 0x7f3   :  { %3936 = vrsqrt.f32 %v1363_v30 }
 0x7fc   :  { %v3935_v33 = vpop.eup %3934 }
 0x7fd   :  { %v1366_v34 = vmul.f32 %v3935_v33, %v1350_v17  ;;  %v3876_v17 = vld [vmem:[%s4735_s3 + $0x18] sm:$0xff]   ;;  %v3213_v33 = vld [vmem:[%s4760_s26 + $0x1] ss:$0 sm:$0xff] }
 0x7ff   :  { %v1374_v38 = vmul.f32 %v3198_v35, %v1366_v34 }
 0x800   :  { %v3937_v36 = vpop.eup %3936 }
 0x801   :  { %v1367_v37 = vmul.f32 %v3937_v36, %v1351_v21  ;;  %v1382_v41 = vadd.f32 %v3199_v39, %v1374_v38 }
 0x803   :  { %v1375_v40 = vmul.f32 %v3198_v35, %v1367_v37  ;;  %v3880_v37 = vld [vmem:[%s4736_s4 + $0x18] sm:$0xff]  }
 0x805   :  { %v1383_v42 = vadd.f32 %v3199_v39, %v1375_v40  ;;  %v3881_v39 = vld [vmem:[%s4736_s4 + $0x10] sm:$0xff]  }
 0x807   :  { %v1388_v43 = vpack.c.bf16 %v1383_v42, %v1382_v41 }
 0x809   :  { %3549 = vmatmul.mubr.msk.bf16.vlgmr.msra.gmra.mxu0 %vm70_vm0, %v1388_v43 }
 0x80a   :  { %3553 = vmatpush3.bf16.msra.mxu0 %v3872_v3  ;;  %3560 = vmatprep.mubr.msk.bf16.mxu0 %vm4001_vm1, %v4000_v15 }
 0x80b   :  { %3554 = vmatprep.subr.bf16.mxu0 %v4000_v15 }
 0x80e   :  { %3555 = vmatpush3.bf16.msra.mxu0 %v3873_v44  ;;  %v3237_v44 = vld [vmem:[%s4740_s8 + $0x1] ss:$0 sm:$0xff] }
 0x80f   :  { %3556 = vmatprep.subr.bf16.mxu0 %v4000_v15 }
 0x812   :  { %3557 = vmatpush3.bf16.msra.mxu0 %v3874_v45 }
 0x813   :  { %3558 = vmatprep.subr.bf16.mxu0 %v4000_v15 }
 0x816   :  { %3559 = vmatpush3.bf16.msra.mxu0 %v3875_v46 }
 0x817   :  { %3564 = vmatprep.subr.bf16.mxu0 %v4000_v15 }
 0x8c9   :  { %v1445_v48 = vpop.f32.mrf.mxu0 }
 0x8ca   :  { %v1446_v51 = vadd.f32 %v3200_v47, %v1445_v48 }
 0x8cb   :  { %v3550_v49 = vpop.f32.mrf.mxu0 }
 0x8cc   :  { %v1452_v55 = vmax.f32 %v1446_v51, 0.0 }
 0x8cd   :  { %v1448_v52 = vpop.f32.mrf.mxu0 }
 0x8ce   :  { %v1449_v53 = vadd.f32 %v3200_v47, %v1448_v52 }
 0x8cf   :  { %v3551_v54 = vpop.f32.mrf.mxu0 }
 0x8d0   :  { %v1453_v56 = vmax.f32 %v1449_v53, 0.0  ;;  %v3228_v54 = vld [vmem:[%s4739_s7 + $0x1] ss:$0 sm:$0xff] }
 0x8d2   :  { %v1462_v57 = vpack.c.bf16 %v1453_v56, %v1452_v55 }
 0x8d4   :  { %3561 = vmatmul.mubr.msk.bf16.vlgmr.msra.gmra.mxu0 %vm1494_vm7, %v1462_v57 }
 0x8d5   :  { %3568 = vmatprep.mubr.msk.bf16.mxu0 %vm4001_vm1, %v4000_v15  ;;  %3565 = vmatpush3.bf16.msra.mxu0 %v3876_v17 }
 0x8d6   :  { %3566 = vmatprep.subr.bf16.mxu0 %v4000_v15 }
 0x8d9   :  { %3567 = vmatpush3.bf16.msra.mxu0 %v3878_v19 }
 0x8da   :  { %3572 = vmatprep.subr.bf16.mxu0 %v4000_v15 }
 0x994   :  { %v1532_v59 = vpop.f32.mrf.mxu0 }
 0x995   :  { %v1533_v60 = vadd.f32 %v3204_v58, %v1532_v59 }
 0x996   :  { %v3562_v61 = vpop.f32.mrf.mxu0 }
 0x997   :  { %v1539_v62 = vadd.f32 %v1533_v60, %v1382_v41 }
 0x998   :  { %v1535_v63 = vpop.f32.mrf.mxu0 }
 0x999   :  { %v1536_v0 = vadd.f32 %v3204_v58, %v1535_v63  ;;  %v1545_v2 = vsel %vm70_vm0, %v1539_v62, 0.0 }
 0x99a   :  { %1546 = vadd.xlane.f32.xlu0 %v1545_v2  ;;  %v3563_v1 = vpop.f32.mrf.mxu0 }
 0x99b   :  { %v1540_v4 = vadd.f32 %v1536_v0, %v1383_v42  ;;  %v3219_v42 = vld [vmem:[%s4738_s6 + $0x1] ss:$0 sm:$0xff] }
 0x99d   :  { %v1548_v5 = vsel %vm70_vm0, %v1540_v4, 0.0 }
 0x99e   :  { %1549 = vadd.xlane.f32.xlu1 %v1548_v5 }
 0xa23   :  { %v1547_v6 = vpop.xlane.xlu0 %1546 }
 0xa24   :  { %v1551_v7 = vmul.f32 0.03125, %v1547_v6 }
 0xa26   :  { %v1553_v8 = vsub.f32 %v1539_v62, %v1551_v7 }
 0xa27   :  { %v1550_v9 = vpop.xlane.xlu1 %1549 }
 0xa28   :  { %v1552_v10 = vmul.f32 0.03125, %v1550_v9  ;;  %v1555_v11 = vmul.f32 %v1553_v8, %v1553_v8 }
 0xa2a   :  { %v1554_v12 = vsub.f32 %v1540_v4, %v1552_v10  ;;  %v1557_v13 = vsel %vm70_vm0, %v1555_v11, 0.0 }
 0xa2b   :  { %1558 = vadd.xlane.f32.xlu0 %v1557_v13 }
 0xa2c   :  { %v1556_v14 = vmul.f32 %v1554_v12, %v1554_v12 }
 0xa2e   :  { %v1560_v16 = vsel %vm70_vm0, %v1556_v14, 0.0 }
 0xa2f   :  { %1561 = vadd.xlane.f32.xlu1 %v1560_v16 }
 0xab4   :  { %v1559_v21 = vpop.xlane.xlu0 %1558 }
 0xab5   :  { %v1563_v31 = vmul.f32 0.03125, %v1559_v21 }
 0xab7   :  { %v1565_v22 = vadd.f32 1e-12, %v1563_v31 }
 0xab8   :  { %v1562_v23 = vpop.xlane.xlu1 %1561 }
 0xab9   :  { %3938 = vrsqrt.f32 %v1565_v22  ;;  %v1564_v32 = vmul.f32 0.03125, %v1562_v23 }
 0xabb   :  { %v1566_v24 = vadd.f32 1e-12, %v1564_v32 }
 0xabd   :  { %3940 = vrsqrt.f32 %v1566_v24 }
 0xac6   :  { %v3939_v25 = vpop.eup %3938 }
 0xac7   :  { %v1569_v26 = vmul.f32 %v3939_v25, %v1553_v8 }
 0xac9   :  { %v1577_v30 = vmul.f32 %v3212_v27, %v1569_v26 }
 0xaca   :  { %v3941_v28 = vpop.eup %3940 }
 0xacb   :  { %v1570_v29 = vmul.f32 %v3941_v28, %v1554_v12  ;;  %v4432_v35 = vadd.f32 %v3213_v33, %v1577_v30 }
 0xacd   :  { %v1578_v34 = vmul.f32 %v3212_v27, %v1570_v29 }
 0xacf   :  { %v4434_v36 = vadd.f32 %v3213_v33, %v1578_v34 }
 0xad1   :  { %v1587_v38 = vpack.c.bf16 %v4434_v36, %v4432_v35 }
 0xad3   :  { %3569 = vmatmul.mubr.msk.bf16.vlgmr.msra.gmra.mxu0 %vm70_vm0, %v1587_v38  ;;  %3585 = vmatmul.mubr.msk.bf16.vlgmr.msra.gmra.mxu1 %vm70_vm0, %v1587_v38 }
 0xad4   :  { %3573 = vmatpush3.bf16.msra.mxu0 %v3880_v37  ;;  %3576 = vmatprep.mubr.msk.bf16.mxu0 %vm4001_vm1, %v4000_v15 }
 0xad5   :  { %3574 = vmatprep.subr.bf16.mxu0 %v4000_v15  ;;  %3596 = vmatprep.mubr.msk.bf16.mxu1 %vm4001_vm1, %v4000_v15 }
 0xad8   :  { %3575 = vmatpush3.bf16.msra.mxu0 %v3881_v39 }
 0xad9   :  { %3588 = vmatprep.subr.bf16.mxu0 %v4000_v15 }
 0xadb   :  { %3577 = vmatmul.mubr.msk.bf16.vlgmr.msra.gmra.mxu0 %vm70_vm0, %v1587_v38 }
 0xadc   :  { %3590 = vmatprep.mubr.msk.bf16.mxu0 %vm4001_vm1, %v4000_v15 }
 0xb93   :  { %v1650_v40 = vpop.f32.mrf.mxu0  ;;  %v1782_v41 = vpop.f32.mrf.mxu1 }
 0xb94   :  { %v1651_v47 = vadd.f32 %v3219_v42, %v1650_v40  ;;  %v4463_v51 = vadd.f32 %v3237_v44, %v1782_v41 }
 0xb95   :  { %v3570_v3 = vpop.f32.mrf.mxu0  ;;  %v3586_v43 = vpop.f32.mrf.mxu1 }
 0xb96   :  { %v1809_v5 = vpack.c.bf16 %v1651_v47, %v1651_v47  ;;  %v1865_v43 = vpack.c.bf16 %v4463_v51, %v4463_v51 }
 0xb97   :  { %v1653_v45 = vpop.f32.mrf.mxu0  ;;  %v1785_v46 = vpop.f32.mrf.mxu1 }
 0xb98   :  { %v1654_v48 = vadd.f32 %v3219_v42, %v1653_v45  ;;  %v4461_v49 = vadd.f32 %v3237_v44, %v1785_v46 }
 0xb99   :  { %v3571_v52 = vpop.f32.mrf.mxu0  ;;  %v3587_v53 = vpop.f32.mrf.mxu1 }
 0xb9a   :  { %v3807_v55 = vpack.i.bf16 %v1654_v48, %v1651_v47  ;;  %v4470_v57 = vpack.i.bf16 %v4461_v49, %v4463_v51  ;;  %v1810_v6 = vpack.c.bf16 %v1654_v48, %v1654_v48  ;;  %v1866_v44 = vpack.c.bf16 %v4461_v49, %v4461_v49 }
 0xb9b   :  { %v1716_v56 = vpop.f32.mrf.mxu0  ;;  %v2349_v47 = vsel %vm872_vm3, %v1865_v43, 0 }
 0xb9c   :  { %v1717_v58 = vadd.f32 %v3228_v54, %v1716_v56  ;;  %3808 = vrot.lane.b32.xlu1 %v3807_v55, %s4002_s25  ;;  %v2395_v48 = vsel %vm872_vm3, %v1866_v44, 0 }
 0xb9d   :  { %v3578_v59 = vpop.f32.mrf.mxu0 }
 0xb9e   :  { %v1837_v60 = vpack.c.bf16 %v1717_v58, %v1717_v58 }
 0xb9f   :  { %v1719_v61 = vpop.f32.mrf.mxu0 }
 0xba0   :  { %v1720_v62 = vadd.f32 %v3228_v54, %v1719_v61  ;;  %v1877_v63 = vsel %vm394_vm2, %v1837_v60, 0 }
 0xba1   :  { %v3579_v0 = vpop.f32.mrf.mxu0  ;;  %3589 = vmatpush3.bf16.xpose.msra.mxu0 %v1877_v63 }
 0xba2   :  { %v3812_v2 = vpack.i.bf16 %v1720_v62, %v1717_v58  ;;  %v1838_v1 = vpack.c.bf16 %v1720_v62, %v1720_v62  ;;  %3600 = vmatprep.subr.bf16.mxu0 %v4000_v15 }
 0xba4   :  { %3813 = vrot.lane.b32.xlu1 %v3812_v2, %s4003_s27  ;;  %3803 = vrot.lane.b32.xlu0 %v3812_v2, %s4002_s25  ;;  %v1923_v4 = vsel %vm394_vm2, %v1838_v1, 0 }
 0xba5   :  { %3595 = vmatpush3.bf16.xpose.msra.mxu1 %v1923_v4 }
 0xba6   :  { %3606 = vmatprep.subr.bf16.mxu1 %v4000_v15 }
 0xba8   :  { %3591 = vmatmul.mubr.msk.bf16.vlgmr.msra.gmra.mxu0 %vm394_vm2, %v1809_v5  ;;  %3818 = vrot.lane.b32.xlu1 %v3807_v55, %s4003_s27 }
 0xba9   :  { %3823 = vrot.lane.b32.xlu0 %v3812_v2, %s4004_s30  ;;  %3602 = vmatprep.mubr.msk.bf16.mxu0 %vm4001_vm1, %v4000_v15 }
 0xbac   :  { %3828 = vrot.lane.b32.xlu1 %v3807_v55, %s4004_s30  ;;  %3597 = vmatmul.mubr.msk.bf16.vlgmr.msra.gmra.mxu1 %vm394_vm2, %v1810_v6 }
 0xbad   :  { %3608 = vmatprep.mubr.msk.bf16.mxu1 %vm4001_vm1, %v4000_v15 }
 0xc0e   :  { %v3809_v7 = vpop.permute.xlu1 %3808 }
 0xc0f   :  { %v3811_v19 = vunpack.i.h.bf16 %v3809_v7  ;;  %v3810_v20 = vunpack.i.l.bf16 %v3809_v7 }
 0xc11   :  { %v1812_v23 = vpack.c.bf16 %v3811_v19, %v3811_v19  ;;  %v1811_v32 = vpack.c.bf16 %v3810_v20, %v3810_v20 }
 0xc16   :  { %v3804_v8 = vpop.permute.xlu0 %3803  ;;  %v3814_v11 = vpop.permute.xlu1 %3813 }
 0xc17   :  { %v3806_v9 = vunpack.i.h.bf16 %v3804_v8  ;;  %v3805_v10 = vunpack.i.l.bf16 %v3804_v8  ;;  %v3816_v14 = vunpack.i.h.bf16 %v3814_v11  ;;  %v3815_v16 = vunpack.i.l.bf16 %v3814_v11 }
 0xc19   :  { %v1840_v12 = vpack.c.bf16 %v3806_v9, %v3806_v9  ;;  %v1839_v13 = vpack.c.bf16 %v3805_v10, %v3805_v10  ;;  %v1842_v21 = vpack.c.bf16 %v3816_v14, %v3816_v14  ;;  %v1841_v31 = vpack.c.bf16 %v3815_v16, %v3815_v16 }
 0xc1a   :  { %v3819_v24 = vpop.permute.xlu1 %3818 }
 0xc1b   :  { %v1969_v17 = vsel %vm394_vm2, %v1839_v13, 0  ;;  %v2015_v18 = vsel %vm394_vm2, %v1840_v12, 0  ;;  %v3824_v22 = vpop.permute.xlu0 %3823  ;;  %v2061_v27 = vsel %vm394_vm2, %v1841_v31, 0  ;;  %v2107_v28 = vsel %vm394_vm2, %v1842_v21, 0 }
 0xc1c   :  { %3601 = vmatpush3.bf16.xpose.msra.mxu0 %v1969_v17  ;;  %3607 = vmatpush3.bf16.xpose.msra.mxu1 %v2015_v18  ;;  %v3826_v25 = vunpack.i.h.bf16 %v3824_v22  ;;  %v3825_v26 = vunpack.i.l.bf16 %v3824_v22  ;;  %v3821_v29 = vunpack.i.h.bf16 %v3819_v24  ;;  %v3820_v30 = vunpack.i.l.bf16 %v3819_v24 }
 0xc1d   :  { %3612 = vmatprep.subr.bf16.mxu0 %v4000_v15  ;;  %3618 = vmatprep.subr.bf16.mxu1 %v4000_v15 }
 0xc1e   :  { %v1844_v33 = vpack.c.bf16 %v3826_v25, %v3826_v25  ;;  %v1843_v34 = vpack.c.bf16 %v3825_v26, %v3825_v26  ;;  %v1814_v37 = vpack.c.bf16 %v3821_v29, %v3821_v29  ;;  %v1813_v38 = vpack.c.bf16 %v3820_v30, %v3820_v30  ;;  %v3829_v39 = vpop.permute.xlu1 %3828 }
 0xc1f   :  { %v3831_v42 = vunpack.i.h.bf16 %v3829_v39  ;;  %v3830_v3 = vunpack.i.l.bf16 %v3829_v39 }
 0xc20   :  { %v2153_v40 = vsel %vm394_vm2, %v1843_v34, 0  ;;  %v2199_v41 = vsel %vm394_vm2, %v1844_v33, 0 }
 0xc21   :  { %v1816_v45 = vpack.c.bf16 %v3831_v42, %v3831_v42  ;;  %v1815_v46 = vpack.c.bf16 %v3830_v3, %v3830_v3 }
 0xc23   :  { %3603 = vmatmul.mubr.msk.bf16.vlgmr.msra.gmra.mxu0 %vm394_vm2, %v1811_v32  ;;  %3609 = vmatmul.mubr.msk.bf16.vlgmr.msra.gmra.mxu1 %vm394_vm2, %v1812_v23 }
 0xc24   :  { %3613 = vmatpush3.bf16.xpose.msra.mxu0 %v2061_v27  ;;  %3619 = vmatpush3.bf16.xpose.msra.mxu1 %v2107_v28 }
 0xc25   :  { %3614 = vmatprep.mubr.msk.bf16.mxu0 %vm4001_vm1, %v4000_v15  ;;  %3620 = vmatprep.mubr.msk.bf16.mxu1 %vm4001_vm1, %v4000_v15 }
 0xc26   :  { %3624 = vmatprep.subr.bf16.mxu0 %v4000_v15  ;;  %3630 = vmatprep.subr.bf16.mxu1 %v4000_v15 }
 0xc2b   :  { %3615 = vmatmul.mubr.msk.bf16.vlgmr.msra.gmra.mxu0 %vm394_vm2, %v1813_v38  ;;  %3621 = vmatmul.mubr.msk.bf16.vlgmr.msra.gmra.mxu1 %vm394_vm2, %v1814_v37 }
 0xc2c   :  { %3625 = vmatpush3.bf16.xpose.msra.mxu0 %v2153_v40  ;;  %3631 = vmatpush3.bf16.xpose.msra.mxu1 %v2199_v41 }
 0xc2d   :  { %3626 = vmatprep.mubr.msk.bf16.mxu0 %vm4001_vm1, %v4000_v15  ;;  %3632 = vmatprep.mubr.msk.bf16.mxu1 %vm4001_vm1, %v4000_v15 }
 0xc2e   :  { %3636 = vmatprep.subr.bf16.mxu0 %v4000_v15  ;;  %3642 = vmatprep.subr.bf16.mxu1 %v4000_v15 }
 0xc33   :  { %3627 = vmatmul.mubr.msk.bf16.vlgmr.msra.gmra.mxu0 %vm394_vm2, %v1815_v46  ;;  %3633 = vmatmul.mubr.msk.bf16.vlgmr.msra.gmra.mxu1 %vm394_vm2, %v1816_v45 }
 0xc34   :  { %3637 = vmatpush3.bf16.msra.mxu0 %v2349_v47  ;;  %3643 = vmatpush3.bf16.msra.mxu1 %v2395_v48 }
 0xc35   :  { %3638 = vmatprep.mubr.msk.bf16.mxu0 %vm4001_vm1, %v4000_v15  ;;  %3644 = vmatprep.mubr.msk.bf16.mxu1 %vm4001_vm1, %v4000_v15 }
 0xc36   :  { %3648 = vmatprep.subr.bf16.mxu0 %v4000_v15  ;;  %3654 = vmatprep.subr.bf16.mxu1 %v4000_v15 }
 0xc68   :  { %v1913_v49 = vpop.f32.mrf.mxu0 }
 0xc69   :  { %v2241_v51 = vsel %vm4237_vm4, %v1913_v49, -1e+30 }
 0xc6a   :  { %v3592_v52 = vpop.f32.mrf.mxu0  ;;  %v2249_v53 = vsel %vm394_vm2, %v2241_v51, -inf }
 0xc6b   :  { %2250 = vmax.xlane.f32.xlu0 %v2249_v53 }
 0xc6c   :  { %v1916_v54 = vpop.f32.mrf.mxu0  ;;  %v1959_v55 = vpop.f32.mrf.mxu1 }
 0xc6d   :  { %v2242_v56 = vsel %vm4237_vm4, %v1959_v55, -1e+30 }
 0xc6e   :  { %v3593_v58 = vpop.f32.mrf.mxu0  ;;  %v3598_v59 = vpop.f32.mrf.mxu1  ;;  %v2252_v60 = vsel %vm394_vm2, %v2242_v56, -inf }
 0xc6f   :  { %2253 = vmax.xlane.f32.xlu1 %v2252_v60 }
 0xc70   :  { %v1962_v61 = vpop.f32.mrf.mxu1 }
 0xc72   :  { %v3599_v62 = vpop.f32.mrf.mxu1 }
 0xce3   :  { %v2005_v63 = vpop.f32.mrf.mxu0  ;;  %v2051_v0 = vpop.f32.mrf.mxu1 }
 0xce4   :  { %v2243_v2 = vsel %vm4237_vm4, %v2005_v63, -1e+30  ;;  %v2244_v6 = vsel %vm4237_vm4, %v2051_v0, -1e+30 }
 0xce5   :  { %v3604_v1 = vpop.f32.mrf.mxu0  ;;  %v3610_v4 = vpop.f32.mrf.mxu1  ;;  %v2255_v5 = vsel %vm394_vm2, %v2243_v2, -inf  ;;  %v2258_v11 = vsel %vm394_vm2, %v2244_v6, -inf }
 0xce6   :  { %2256 = vmax.xlane.f32.xlu0 %v2255_v5 }
 0xce7   :  { %v2008_v7 = vpop.f32.mrf.mxu0  ;;  %v2054_v8 = vpop.f32.mrf.mxu1 }
 0xce9   :  { %v3605_v9 = vpop.f32.mrf.mxu0  ;;  %v3611_v10 = vpop.f32.mrf.mxu1 }
 0xcea   :  { %2259 = vmax.xlane.f32.xlu0 %v2258_v11 }
 0xceb   :  { %v2097_v12 = vpop.f32.mrf.mxu0  ;;  %v2143_v13 = vpop.f32.mrf.mxu1 }
 0xcec   :  { %v2245_v14 = vsel %vm4237_vm4, %v2097_v12, -1e+30  ;;  %v2246_v16 = vsel %vm4237_vm4, %v2143_v13, -1e+30 }
 0xced   :  { %v3616_v17 = vpop.f32.mrf.mxu0  ;;  %v3622_v18 = vpop.f32.mrf.mxu1  ;;  %v2264_v19 = vsel %vm394_vm2, %v2246_v16, -inf  ;;  %v2261_v20 = vsel %vm394_vm2, %v2245_v14, -inf }
 0xcee   :  { %2265 = vmax.xlane.f32.xlu1 %v2264_v19  ;;  %2262 = vmax.xlane.f32.xlu0 %v2261_v20 }
 0xcef   :  { %v2100_v21 = vpop.f32.mrf.mxu0  ;;  %v2146_v31 = vpop.f32.mrf.mxu1 }
 0xcf1   :  { %v3617_v22 = vpop.f32.mrf.mxu0  ;;  %v3623_v23 = vpop.f32.mrf.mxu1 }
 0xcf3   :  { %v2189_v32 = vpop.f32.mrf.mxu0  ;;  %v2235_v24 = vpop.f32.mrf.mxu1 }
 0xcf4   :  { %v2247_v25 = vsel %vm4237_vm4, %v2189_v32, -1e+30  ;;  %v4548_v26 = vsel %vm4237_vm4, %v2235_v24, -1e+30  ;;  %v2251_v27 = vpop.xlane.xlu0 %2250 }
 0xcf5   :  { %v2273_v28 = vsub.f32 %v2241_v51, %v2251_v27  ;;  %v3628_v29 = vpop.f32.mrf.mxu0  ;;  %v3634_v30 = vpop.f32.mrf.mxu1  ;;  %v2270_v33 = vsel %vm394_vm2, %v4548_v26, -inf  ;;  %v2267_v34 = vsel %vm394_vm2, %v2247_v25, -inf }
 0xcf6   :  { %2271 = vmax.xlane.f32.xlu1 %v2270_v33  ;;  %2268 = vmax.xlane.f32.xlu0 %v2267_v34 }
 0xcf7   :  { %v2281_v37 = vmul.f32 1.442695, %v2273_v28  ;;  %v2192_v38 = vpop.f32.mrf.mxu0  ;;  %v2238_v39 = vpop.f32.mrf.mxu1 }
 0xcf8   :  { %v2254_v40 = vpop.xlane.xlu1 %2253 }
 0xcf9   :  { %3942 = vpow2.f32 %v2281_v37  ;;  %v2274_v41 = vsub.f32 %v2242_v56, %v2254_v40  ;;  %v3629_v50 = vpop.f32.mrf.mxu0  ;;  %v3635_v42 = vpop.f32.mrf.mxu1 }
 0xcfb   :  { %v2283_v3 = vmul.f32 1.442695, %v2274_v41 }
 0xcfd   :  { %3944 = vpow2.f32 %v2283_v3 }
 0xd06   :  { %v3943_v43 = vpop.eup %3942 }
 0xd07   :  { %v2297_v44 = vsel %vm394_vm2, %v3943_v43, 0.0 }
 0xd08   :  { %2298 = vadd.xlane.f32.xlu0 %v2297_v44 }
 0xd0a   :  { %v3945_v45 = vpop.eup %3944 }
 0xd0b   :  { %v2300_v46 = vsel %vm394_vm2, %v3945_v45, 0.0 }
 0xd0c   :  { %2301 = vadd.xlane.f32.xlu1 %v2300_v46 }
 0xd6f   :  { %v2257_v47 = vpop.xlane.xlu0 %2256 }
 0xd70   :  { %v2275_v48 = vsub.f32 %v2243_v2, %v2257_v47 }
 0xd72   :  { %v2285_v49 = vmul.f32 1.442695, %v2275_v48 }
 0xd73   :  { %v2260_v51 = vpop.xlane.xlu0 %2259 }
 0xd74   :  { %3946 = vpow2.f32 %v2285_v49  ;;  %v2276_v52 = vsub.f32 %v2244_v6, %v2260_v51 }
 0xd76   :  { %v2287_v53 = vmul.f32 1.442695, %v2276_v52 }
 0xd77   :  { %v2266_v54 = vpop.xlane.xlu1 %2265  ;;  %v2263_v55 = vpop.xlane.xlu0 %2262 }
 0xd78   :  { %3948 = vpow2.f32 %v2287_v53  ;;  %v2278_v56 = vsub.f32 %v2246_v16, %v2266_v54  ;;  %v2277_v58 = vsub.f32 %v2245_v14, %v2263_v55 }
 0xd7a   :  { %v2291_v59 = vmul.f32 1.442695, %v2278_v56  ;;  %v2289_v60 = vmul.f32 1.442695, %v2277_v58 }
 0xd7c   :  { %3950 = vpow2.f32 %v2291_v59 }
 0xd7d   :  { %3952 = vpow2.f32 %v2289_v60 }
 0xd7f   :  { %v2269_v61 = vpop.xlane.xlu0 %2268  ;;  %v2272_v9 = vpop.xlane.xlu1 %2271 }
 0xd80   :  { %v2279_v62 = vsub.f32 %v2247_v25, %v2269_v61  ;;  %v2280_v21 = vsub.f32 %v4548_v26, %v2272_v9 }
 0xd81   :  { %v3947_v63 = vpop.eup %3946 }
 0xd82   :  { %v2293_v0 = vmul.f32 1.442695, %v2279_v62  ;;  %v2303_v2 = vsel %vm394_vm2, %v3947_v63, 0.0  ;;  %v2295_v31 = vmul.f32 1.442695, %v2280_v21 }
 0xd83   :  { %2304 = vadd.xlane.f32.xlu0 %v2303_v2 }
 0xd84   :  { %3954 = vpow2.f32 %v2293_v0 }
 0xd85   :  { %v3949_v1 = vpop.eup %3948 }
 0xd86   :  { %v2306_v4 = vsel %vm394_vm2, %v3949_v1, 0.0 }
 0xd87   :  { %2307 = vadd.xlane.f32.xlu1 %v2306_v4 }
 0xd89   :  { %v4557_v5 = vpop.eup %3950 }
 0xd8a   :  { %v4559_v6 = vpop.eup %3952  ;;  %v2312_v7 = vsel %vm394_vm2, %v4557_v5, 0.0 }
 0xd8b   :  { %2313 = vadd.xlane.f32.xlu1 %v2312_v7  ;;  %v2309_v8 = vsel %vm394_vm2, %v4559_v6, 0.0 }
 0xd8c   :  { %2310 = vadd.xlane.f32.xlu0 %v2309_v8 }
 0xd91   :  { %v2299_v10 = vpop.xlane.xlu0 %2298  ;;  %v4565_v11 = vpop.eup %3954 }
 0xd92   :  { %3956 = vrcp.f32 %v2299_v10  ;;  %v2315_v12 = vsel %vm394_vm2, %v4565_v11, 0.0 }
 0xd93   :  { %2316 = vadd.xlane.f32.xlu0 %v2315_v12 }
 0xd95   :  { %v2302_v13 = vpop.xlane.xlu1 %2301 }
 0xd96   :  { %3958 = vrcp.f32 %v2302_v13 }
 0xd97   :  { %3960 = vpow2.f32 %v2295_v31 }
 0xd9c   :  { %3838 = vrot.lane.b32.xlu1 %v4470_v57, %s4003_s27  ;;  %s4763_s27 = smov 24  }
 0xd9f   :  { %v3957_v14 = vpop.eup %3956 }
 0xda0   :  { %v2329_v16 = vmul.f32 %v3957_v14, %v3943_v43 }
 0xda2   :  { %v2337_v17 = vpack.c.bf16 %v2329_v16, %v2329_v16 }
 0xda3   :  { %v3959_v18 = vpop.eup %3958 }
 0xda4   :  { %3639 = vmatmul.mubr.msk.bf16.vlgmr.msra.gmra.mxu0 %vm394_vm2, %v2337_v17  ;;  %v2330_v19 = vmul.f32 %v3959_v18, %v3945_v45  ;;  %v4580_v22 = vpop.eup %3960 }
 0xda5   :  { %3650 = vmatprep.mubr.msk.bf16.mxu0 %vm4001_vm1, %v4000_v15  ;;  %v2318_v23 = vsel %vm394_vm2, %v4580_v22, 0.0 }
 0xda6   :  { %v2338_v20 = vpack.c.bf16 %v2330_v19, %v2330_v19  ;;  %v3882_v19 = vld [vmem:[%s4741_s9 + $0x18] sm:$0xff]  }
 0xda8   :  { %3645 = vmatmul.mubr.msk.bf16.vlgmr.msra.gmra.mxu1 %vm394_vm2, %v2338_v20 }
 0xda9   :  { %3656 = vmatprep.mubr.msk.bf16.mxu1 %vm4001_vm1, %v4000_v15  ;;  %3833 = vrot.lane.b32.xlu0 %v4470_v57, %s4002_s25 }
 0xdc0   :  { %2319 = vadd.xlane.f32.xlu1 %v2318_v23 }
 0xdd1   :  { %3843 = vrot.lane.b32.xlu1 %v4470_v57, %s4004_s30 }
 0xe0c   :  { %v2305_v32 = vpop.xlane.xlu0 %2304 }
 0xe0d   :  { %3962 = vrcp.f32 %v2305_v32 }
 0xe10   :  { %v2308_v24 = vpop.xlane.xlu1 %2307 }
 0xe11   :  { %3964 = vrcp.f32 %v2308_v24 }
 0xe14   :  { %v2314_v25 = vpop.xlane.xlu1 %2313 }
 0xe15   :  { %v2311_v26 = vpop.xlane.xlu0 %2310  ;;  %3966 = vrcp.f32 %v2314_v25 }
 0xe16   :  { %3968 = vrcp.f32 %v2311_v26 }
 0xe18   :  { %v3839_v28 = vpop.permute.xlu1 %3838 }
 0xe19   :  { %v3841_v34 = vunpack.i.h.bf16 %v3839_v28  ;;  %v3840_v37 = vunpack.i.l.bf16 %v3839_v28 }
 0xe1a   :  { %v3963_v29 = vpop.eup %3962 }
 0xe1b   :  { %v2331_v57 = vmul.f32 %v3963_v29, %v3947_v63  ;;  %v1870_v42 = vpack.c.bf16 %v3841_v34, %v3841_v34  ;;  %v1869_v3 = vpack.c.bf16 %v3840_v37, %v3840_v37 }
 0xe1c   :  { %v2317_v27 = vpop.xlane.xlu0 %2316 }
 0xe1d   :  { %v2339_v46 = vpack.c.bf16 %v2331_v57, %v2331_v57  ;;  %v2533_v49 = vsel %vm872_vm3, %v1869_v3, 0  ;;  %v2579_v51 = vsel %vm872_vm3, %v1870_v42, 0  ;;  %3970 = vrcp.f32 %v2317_v27 }
 0xe1e   :  { %v3965_v30 = vpop.eup %3964 }
 0xe1f   :  { %v2332_v50 = vmul.f32 %v3965_v30, %v3949_v1 }
 0xe20   :  { %v3834_v33 = vpop.permute.xlu0 %3833 }
 0xe21   :  { %v3836_v38 = vunpack.i.h.bf16 %v3834_v33  ;;  %v3835_v39 = vunpack.i.l.bf16 %v3834_v33  ;;  %v2340_v47 = vpack.c.bf16 %v2332_v50, %v2332_v50 }
 0xe22   :  { %v3967_v45 = vpop.eup %3966 }
 0xe23   :  { %v1868_v40 = vpack.c.bf16 %v3836_v38, %v3836_v38  ;;  %v1867_v41 = vpack.c.bf16 %v3835_v39, %v3835_v39  ;;  %v3969_v48 = vpop.eup %3968  ;;  %v2334_v53 = vmul.f32 %v3967_v45, %v4557_v5  ;;  %v3883_v38 = vld [vmem:[%s4741_s9 + $0x10] sm:$0xff]  }
 0xe24   :  { %v2333_v52 = vmul.f32 %v3969_v48, %v4559_v6 }
 0xe25   :  { %v2441_v43 = vsel %vm872_vm3, %v1867_v41, 0  ;;  %v2487_v44 = vsel %vm872_vm3, %v1868_v40, 0  ;;  %v2342_v55 = vpack.c.bf16 %v2334_v53, %v2334_v53 }
 0xe26   :  { %3649 = vmatpush3.bf16.msra.mxu0 %v2441_v43  ;;  %3655 = vmatpush3.bf16.msra.mxu1 %v2487_v44  ;;  %v2341_v54 = vpack.c.bf16 %v2333_v52, %v2333_v52 }
 0xe27   :  { %3660 = vmatprep.subr.bf16.mxu0 %v4000_v15  ;;  %3666 = vmatprep.subr.bf16.mxu1 %v4000_v15 }
 0xe29   :  { %3651 = vmatmul.mubr.msk.bf16.vlgmr.msra.gmra.mxu0 %vm394_vm2, %v2339_v46  ;;  %3657 = vmatmul.mubr.msk.bf16.vlgmr.msra.gmra.mxu1 %vm394_vm2, %v2340_v47 }
 0xe2a   :  { %3661 = vmatpush3.bf16.msra.mxu0 %v2533_v49  ;;  %3667 = vmatpush3.bf16.msra.mxu1 %v2579_v51  ;;  %v3971_v58 = vpop.eup %3970 }
 0xe2b   :  { %3662 = vmatprep.mubr.msk.bf16.mxu0 %vm4001_vm1, %v4000_v15  ;;  %3668 = vmatprep.mubr.msk.bf16.mxu1 %vm4001_vm1, %v4000_v15  ;;  %v2335_v0 = vmul.f32 %v3971_v58, %v4565_v11 }
 0xe2c   :  { %3672 = vmatprep.subr.bf16.mxu0 %v4000_v15  ;;  %3678 = vmatprep.subr.bf16.mxu1 %v4000_v15 }
 0xe2d   :  { %v2343_v4 = vpack.c.bf16 %v2335_v0, %v2335_v0 }
 0xe31   :  { %3663 = vmatmul.mubr.msk.bf16.vlgmr.msra.gmra.mxu0 %vm394_vm2, %v2341_v54  ;;  %3669 = vmatmul.mubr.msk.bf16.vlgmr.msra.gmra.mxu1 %vm394_vm2, %v2342_v55 }
 0xe32   :  { %3674 = vmatprep.mubr.msk.bf16.mxu0 %vm4001_vm1, %v4000_v15  ;;  %3680 = vmatprep.mubr.msk.bf16.mxu1 %vm4001_vm1, %v4000_v15 }
 0xe49   :  { %v2320_v56 = vpop.xlane.xlu1 %2319 }
 0xe4a   :  { %3972 = vrcp.f32 %v2320_v56 }
 0xe4d   :  { %v3844_v59 = vpop.permute.xlu1 %3843 }
 0xe4e   :  { %v3846_v60 = vunpack.i.h.bf16 %v3844_v59  ;;  %v3845_v61 = vunpack.i.l.bf16 %v3844_v59 }
 0xe50   :  { %v1872_v62 = vpack.c.bf16 %v3846_v60, %v3846_v60  ;;  %v1871_v63 = vpack.c.bf16 %v3845_v61, %v3845_v61 }
 0xe52   :  { %v2625_v2 = vsel %vm872_vm3, %v1871_v63, 0  ;;  %v2671_v1 = vsel %vm872_vm3, %v1872_v62, 0  ;;  %v3262_v63 = vld [vmem:[%s4742_s10 + $0x1] ss:$0 sm:$0xff] }
 0xe53   :  { %3673 = vmatpush3.bf16.msra.mxu0 %v2625_v2  ;;  %3679 = vmatpush3.bf16.msra.mxu1 %v2671_v1 }
 0xe54   :  { %3684 = vmatprep.subr.bf16.mxu0 %v4000_v15  ;;  %3692 = vmatprep.subr.bf16.mxu1 %v4000_v15 }
 0xe56   :  { %3675 = vmatmul.mubr.msk.bf16.vlgmr.msra.gmra.mxu0 %vm394_vm2, %v2343_v4 }
 0xe57   :  { %v3973_v5 = vpop.eup %3972  ;;  %3688 = vmatprep.mubr.msk.bf16.mxu0 %vm4001_vm1, %v4000_v15  ;;  %3685 = vmatpush3.bf16.msra.mxu0 %v3882_v19 }
 0xe58   :  { %v2336_v6 = vmul.f32 %v3973_v5, %v4580_v22  ;;  %3686 = vmatprep.subr.bf16.mxu0 %v4000_v15 }
 0xe5a   :  { %v2344_v7 = vpack.c.bf16 %v2336_v6, %v2336_v6 }
 0xe5b   :  { %3687 = vmatpush3.bf16.msra.mxu0 %v3883_v38 }
 0xe5c   :  { %3681 = vmatmul.mubr.msk.bf16.vlgmr.msra.gmra.mxu1 %vm394_vm2, %v2344_v7  ;;  %3700 = vmatprep.subr.bf16.mxu0 %v4000_v15 }
 0xe5d   :  { %3696 = vmatprep.mubr.msk.bf16.mxu1 %vm4001_vm1, %v4000_v15 }
 0xe64   :  { %v2385_v8 = vpop.f32.mrf.mxu0 }
 0xe66   :  { %v3640_v9 = vpop.f32.mrf.mxu0 }
 0xe68   :  { %v2388_v10 = vpop.f32.mrf.mxu0  ;;  %v2431_v11 = vpop.f32.mrf.mxu1 }
 0xe6a   :  { %v3641_v12 = vpop.f32.mrf.mxu0  ;;  %v3646_v13 = vpop.f32.mrf.mxu1 }
 0xe6c   :  { %v2434_v14 = vpop.f32.mrf.mxu1 }
 0xe6e   :  { %v3647_v16 = vpop.f32.mrf.mxu1 }
 0xee9   :  { %v2477_v17 = vpop.f32.mrf.mxu0  ;;  %v2523_v18 = vpop.f32.mrf.mxu1 }
 0xeea   :  { %v3847_v20 = vpack.i.bf16 %v2523_v18, %v2477_v17 }
 0xeeb   :  { %v3652_v21 = vpop.f32.mrf.mxu0  ;;  %v3658_v31 = vpop.f32.mrf.mxu1 }
 0xeec   :  { %3848 = vrot.lane.b32.xlu1 %v3847_v20, %s4005_s1  ;;  %v3885_v21 = vld [vmem:[%s4745_s13 + $0x10] sm:$0xff]   ;;  %v3886_v31 = vld [vmem:[%s4747_s15 + $0x38] sm:$0xff]  }
 0xeed   :  { %v2480_v22 = vpop.f32.mrf.mxu0  ;;  %v2526_v23 = vpop.f32.mrf.mxu1 }
 0xeef   :  { %v3653_v32 = vpop.f32.mrf.mxu0  ;;  %v3659_v24 = vpop.f32.mrf.mxu1 }
 0xef1   :  { %v2569_v25 = vpop.f32.mrf.mxu0  ;;  %v2615_v26 = vpop.f32.mrf.mxu1 }
 0xef2   :  { %v3852_v27 = vpack.i.bf16 %v2615_v26, %v2569_v25 }
 0xef3   :  { %v3664_v28 = vpop.f32.mrf.mxu0  ;;  %v3670_v29 = vpop.f32.mrf.mxu1 }
 0xef4   :  { %3853 = vrot.lane.b32.xlu0 %v3852_v27, %s4006_s20  ;;  %v3268_v29 = vld [vmem:[%s4743_s11 + $0x1] ss:$0 sm:$0xff] }
 0xef5   :  { %v2572_v30 = vpop.f32.mrf.mxu0  ;;  %v2618_v33 = vpop.f32.mrf.mxu1 }
 0xef7   :  { %v3665_v34 = vpop.f32.mrf.mxu0  ;;  %v3671_v37 = vpop.f32.mrf.mxu1 }
 0xef8   :  { %v3269_v37 = vld [vmem:[%s4744_s12 + $0x1] ss:$0 sm:$0xff] }
 0xf16   :  { %v2661_v39 = vpop.f32.mrf.mxu0 }
 0xf18   :  { %v3676_v40 = vpop.f32.mrf.mxu0 }
 0xf1a   :  { %v2664_v41 = vpop.f32.mrf.mxu0 }
 0xf1c   :  { %v3677_v57 = vpop.f32.mrf.mxu0  ;;  %v2707_v50 = vpop.f32.mrf.mxu1 }
 0xf1d   :  { %v3857_v42 = vpack.i.bf16 %v2707_v50, %v2661_v39  ;;  %v3887_v57 = vld [vmem:[%s4747_s15 + $0x30] sm:$0xff]   ;;  %v3888_v50 = vld [vmem:[%s4747_s15 + $0x28] sm:$0xff]  }
 0xf1e   :  { %v3682_v3 = vpop.f32.mrf.mxu1 }
 0xf1f   :  { %3858 = vrot.lane.b32.xlu1 %v3857_v42, %s4763_s27  ;;  %v3889_v42 = vld [vmem:[%s4747_s15 + $0x20] sm:$0xff]   ;;  %v3890_v3 = vld [vmem:[%s4749_s17 + $0x38] sm:$0xff]  }
 0xf20   :  { %v2710_v43 = vpop.f32.mrf.mxu1 }
 0xf21   :  { %v3103_v43 = vsel %vm70_vm0, %v3890_v3, 0 }
 0xf22   :  { %v3683_v44 = vpop.f32.mrf.mxu1 }
 0xf23   :  { %v3891_v44 = vld [vmem:[%s4749_s17 + $0x30] sm:$0xff]  }
 0xf5e   :  { %v3849_v45 = vpop.permute.xlu1 %3848 }
 0xf5f   :  { %v3851_v47 = vunpack.i.h.bf16 %v3849_v45  ;;  %v3850_v48 = vunpack.i.l.bf16 %v3849_v45  ;;  %v3100_v45 = vsel %vm70_vm0, %v3891_v44, 0 }
 0xf61   :  { %v2738_v53 = vsel %vm394_vm2, %v2431_v11, %v3851_v47  ;;  %v2737_v54 = vsel %vm394_vm2, %v2385_v8, %v3850_v48  ;;  %v3893_v48 = vld [vmem:[%s4749_s17 + $0x20] sm:$0xff]  }
 0xf66   :  { %v3854_v46 = vpop.permute.xlu0 %3853 }
 0xf67   :  { %v3856_v49 = vunpack.i.h.bf16 %v3854_v46  ;;  %v3855_v51 = vunpack.i.l.bf16 %v3854_v46  ;;  %v3892_v46 = vld [vmem:[%s4749_s17 + $0x28] sm:$0xff]  }
 0xf68   :  { %v3097_v47 = vsel %vm70_vm0, %v3892_v46, 0 }
 0xf69   :  { %v2740_v58 = vsel %vm1264_vm5, %v2738_v53, %v3856_v49  ;;  %v2739_v59 = vsel %vm1264_vm5, %v2737_v54, %v3855_v51  ;;  %v3094_v49 = vsel %vm70_vm0, %v3893_v48, 0  ;;  %v3894_v51 = vld [vmem:[%s4749_s17 + $0x18] sm:$0xff]   ;;  %v3895_v53 = vld [vmem:[%s4749_s17 + $0x10] sm:$0xff]  }
 0xf6a   :  { %v3088_v54 = vsel %vm70_vm0, %v3895_v53, 0 }
 0xf91   :  { %v3859_v52 = vpop.permute.xlu1 %3858 }
 0xf92   :  { %v3861_v55 = vunpack.i.h.bf16 %v3859_v52  ;;  %v3860_v56 = vunpack.i.l.bf16 %v3859_v52  ;;  %v3091_v52 = vsel %vm70_vm0, %v3894_v51, 0 }
 0xf94   :  { %v2742_v60 = vsel %vm1267_vm6, %v2740_v58, %v3861_v55  ;;  %v2741_v61 = vsel %vm1267_vm6, %v2739_v59, %v3860_v56  ;;  %v3896_v55 = vld [vmem:[%s4749_s17 + $0x8] sm:$0xff]   ;;  %v3275_v58 = vld [vmem:[%s4746_s14 + $0x1] ss:$0 sm:$0xff] }
 0xf95   :  { %v2748_v62 = vpack.c.bf16 %v2742_v60, %v2741_v61  ;;  %v3085_v56 = vsel %vm70_vm0, %v3896_v55, 0 }
 0xf97   :  { %3689 = vmatmul.mubr.msk.bf16.vlgmr.msra.gmra.mxu0 %vm70_vm0, %v2748_v62 }
 0xf98   :  { %3708 = vmatprep.mubr.msk.bf16.mxu0 %vm4001_vm1, %v4000_v15  ;;  %3701 = vmatpush3.bf16.msra.mxu0 %v3886_v31 }
 0xf99   :  { %3702 = vmatprep.subr.bf16.mxu0 %v4000_v15 }
 0xf9c   :  { %3703 = vmatpush3.bf16.msra.mxu0 %v3887_v57 }
 0xf9d   :  { %3704 = vmatprep.subr.bf16.mxu0 %v4000_v15 }
 0xfa0   :  { %3705 = vmatpush3.bf16.msra.mxu0 %v3888_v50 }
 0xfa1   :  { %3706 = vmatprep.subr.bf16.mxu0 %v4000_v15 }
 0xfa4   :  { %3707 = vmatpush3.bf16.msra.mxu0 %v3889_v42 }
0x1057   :  { %v2806_v0 = vpop.f32.mrf.mxu0 }
0x1058   :  { %v2807_v2 = vadd.f32 %v3262_v63, %v2806_v0 }
0x1059   :  { %v3690_v1 = vpop.f32.mrf.mxu0 }
0x105a   :  { %v2813_v4 = vadd.f32 %v2807_v2, %v4432_v35 }
0x105b   :  { %v2809_v5 = vpop.f32.mrf.mxu0 }
0x105c   :  { %v2810_v6 = vadd.f32 %v3262_v63, %v2809_v5  ;;  %v2819_v7 = vsel %vm70_vm0, %v2813_v4, 0.0  ;;  %v3897_v5 = vld [vmem:[%s4749_s17] sm:$0xff]   ;;  %s4008_s17 = smov [#allocation2]  }
0x105d   :  { %2820 = vadd.xlane.f32.xlu0 %v2819_v7  ;;  %v3691_v8 = vpop.f32.mrf.mxu0  ;;  %s3153_s19 = sshll.u32 %s4008_s17, 4  ;;  %s3154_s19 = int_to_ptr.vmem [resolvable:$true] %s3153_s19 }
0x105e   :  { %v2814_v9 = vadd.f32 %v2810_v6, %v4434_v36  ;;  %v3884_v36 = vld [vmem:[%s4745_s13 + $0x18] sm:$0xff]   ;;  %v3288_v6 = vld [vmem:[%s4748_s16 + $0x1] ss:$0 sm:$0xff]  ;;  %s3978_s16 = scalar_lea.vmem %s3154_s19, 256  ;;  %p3983_p1 = scmp.lt.s32.totalorder %s3154_s19, %s3154_s19 }
0x105f   :  { %3693 = vmatpush3.bf16.msra.mxu1 %v3884_v36  ;;  %p3979_p0 = scmp.ne.s32.totalorder %s3154_s19, %s3978_s16  ;;  %p3984_p2 = scmp.lt.s32.totalorder %s3978_s16, %s3978_s16 }
0x1060   :  { %v2822_v10 = vsel %vm70_vm0, %v2814_v9, 0.0  ;;  %3694 = vmatprep.subr.bf16.mxu1 %v4000_v15 }
0x1061   :  { %2823 = vadd.xlane.f32.xlu1 %v2822_v10  ;;  %p3985_p3 = por %p3984_p2, %p3983_p1 }
0x1063   :  { %3695 = vmatpush3.bf16.msra.mxu1 %v3885_v21  ;;  %p3986_p4 = pnand %p3985_p3, %p3979_p0 }
0x1064   :  { %3712 = vmatprep.subr.bf16.mxu1 %v4000_v15 }
0x10e6   :  { %v2821_v11 = vpop.xlane.xlu0 %2820 }
0x10e7   :  { %v2825_v12 = vmul.f32 0.03125, %v2821_v11 }
0x10e9   :  { %v2827_v13 = vsub.f32 %v2813_v4, %v2825_v12 }
0x10ea   :  { %v2824_v14 = vpop.xlane.xlu1 %2823 }
0x10eb   :  { %v2826_v16 = vmul.f32 0.03125, %v2824_v14  ;;  %v2829_v17 = vmul.f32 %v2827_v13, %v2827_v13 }
0x10ed   :  { %v2828_v18 = vsub.f32 %v2814_v9, %v2826_v16  ;;  %v2831_v35 = vsel %vm70_vm0, %v2829_v17, 0.0 }
0x10ee   :  { %2832 = vadd.xlane.f32.xlu0 %v2831_v35 }
0x10ef   :  { %v2830_v19 = vmul.f32 %v2828_v18, %v2828_v18 }
0x10f1   :  { %v2834_v20 = vsel %vm70_vm0, %v2830_v19, 0.0 }
0x10f2   :  { %2835 = vadd.xlane.f32.xlu0 %v2834_v20 }
0x1177   :  { %v2833_v22 = vpop.xlane.xlu0 %2832 }
0x1178   :  { %v2837_v23 = vmul.f32 0.03125, %v2833_v22 }
0x117a   :  { %v2839_v32 = vadd.f32 1e-12, %v2837_v23 }
0x117b   :  { %v2836_v24 = vpop.xlane.xlu0 %2835 }
0x117c   :  { %3974 = vrsqrt.f32 %v2839_v32  ;;  %v2838_v25 = vmul.f32 0.03125, %v2836_v24 }
0x117e   :  { %v2840_v26 = vadd.f32 1e-12, %v2838_v25 }
0x1180   :  { %3976 = vrsqrt.f32 %v2840_v26 }
0x1189   :  { %v3975_v27 = vpop.eup %3974 }
0x118a   :  { %v2843_v28 = vmul.f32 %v3975_v27, %v2827_v13 }
0x118c   :  { %v2851_v34 = vmul.f32 %v3268_v29, %v2843_v28 }
0x118d   :  { %v3977_v30 = vpop.eup %3976 }
0x118e   :  { %v2844_v33 = vmul.f32 %v3977_v30, %v2828_v18  ;;  %v2859_v39 = vadd.f32 %v3269_v37, %v2851_v34 }
0x1190   :  { %v2852_v38 = vmul.f32 %v3268_v29, %v2844_v33 }
0x1192   :  { %v2860_v40 = vadd.f32 %v3269_v37, %v2852_v38 }
0x1194   :  { %v2866_v41 = vpack.c.bf16 %v2860_v40, %v2859_v39 }
0x1196   :  { %3697 = vmatmul.mubr.msk.bf16.vlgmr.msra.gmra.mxu1 %vm70_vm0, %v2866_v41 }
0x1197   :  { %3728 = vmatprep.mubr.msk.bf16.mxu1 %vm4001_vm1, %v4000_v15  ;;  %3713 = vmatpush3.bf16.xpose.msra.mxu1 %v3103_v43 }
0x1198   :  { %3714 = vmatprep.subr.bf16.mxu1 %v4000_v15 }
0x119f   :  { %3715 = vmatpush3.bf16.xpose.msra.mxu1 %v3100_v45 }
0x11a0   :  { %3716 = vmatprep.subr.bf16.mxu1 %v4000_v15 }
0x11a7   :  { %3717 = vmatpush3.bf16.xpose.msra.mxu1 %v3097_v47 }
0x11a8   :  { %3718 = vmatprep.subr.bf16.mxu1 %v4000_v15 }
0x11af   :  { %3719 = vmatpush3.bf16.xpose.msra.mxu1 %v3094_v49 }
0x11b0   :  { %3720 = vmatprep.subr.bf16.mxu1 %v4000_v15 }
0x11b7   :  { %3721 = vmatpush3.bf16.xpose.msra.mxu1 %v3091_v52 }
0x11b8   :  { %3722 = vmatprep.subr.bf16.mxu1 %v4000_v15 }
0x11bf   :  { %3723 = vmatpush3.bf16.xpose.msra.mxu1 %v3088_v54 }
0x11c0   :  { %3724 = vmatprep.subr.bf16.mxu1 %v4000_v15 }
0x11c7   :  { %3725 = vmatpush3.bf16.xpose.msra.mxu1 %v3085_v56 }
0x11c8   :  { %3726 = vmatprep.subr.bf16.mxu1 %v4000_v15  ;;  %v3082_v15 = vsel %vm70_vm0, %v3897_v5, 0 }
0x11cf   :  { %3727 = vmatpush3.bf16.xpose.msra.mxu1 %v3082_v15 }
0x1256   :  { %v2924_v59 = vpop.f32.mrf.mxu1 }
0x1257   :  { %v2925_v61 = vadd.f32 %v3275_v58, %v2924_v59 }
0x1258   :  { %v3698_v60 = vpop.f32.mrf.mxu1 }
0x1259   :  { %v2931_v2 = vmax.f32 %v2925_v61, 0.0 }
0x125a   :  { %v2927_v62 = vpop.f32.mrf.mxu1 }
0x125b   :  { %v2928_v63 = vadd.f32 %v3275_v58, %v2927_v62 }
0x125c   :  { %v3699_v0 = vpop.f32.mrf.mxu1 }
0x125d   :  { %v2932_v1 = vmax.f32 %v2928_v63, 0.0 }
0x125f   :  { %v2942_v4 = vpack.c.bf16 %v2932_v1, %v2931_v2 }
0x1261   :  { %3709 = vmatmul.mubr.msk.bf16.vlgmr.msra.gmra.mxu0 %vm1494_vm7, %v2942_v4 }
0x1321   :  { %v3012_v7 = vpop.f32.mrf.mxu0 }
0x1322   :  { %v3013_v9 = vadd.f32 %v3288_v6, %v3012_v7 }
0x1323   :  { %v3710_v8 = vpop.f32.mrf.mxu0 }
0x1324   :  { %v3019_v13 = vadd.f32 %v3013_v9, %v2859_v39 }
0x1325   :  { %v3015_v10 = vpop.f32.mrf.mxu0 }
0x1326   :  { %v3016_v11 = vadd.f32 %v3288_v6, %v3015_v10 }
0x1327   :  { %v3711_v12 = vpop.f32.mrf.mxu0 }
0x1328   :  { %v3020_v14 = vadd.f32 %v3016_v11, %v2860_v40 }
0x132a   :  { %v3021_v16 = vpack.c.bf16 %v3020_v14, %v3019_v13 }
0x132c   :  { %3729 = vmatmul.mubr.msk.bf16.vlgmr.msra.gmra.mxu1 %vm70_vm0, %v3021_v16 }
0x13ec   :  { %v3139_v17 = vpop.f32.mrf.mxu1 }
0x13ed   :  { %3146 = vst [vmem:[#allocation2] sm:$0xff] %v3139_v17 }
0x13ee   :  { %v3730_v18 = vpop.f32.mrf.mxu1 }
0x13f0   :  { %v3142_v35 = vpop.f32.mrf.mxu1 }
0x13f1   :  { %3147 = vst [vmem:[#allocation2 + $0x8] sm:$0xff] %v3142_v35 }
0x13f2   :  { %v3731_v19 = vpop.f32.mrf.mxu1 }
0x13f3   :  { %3989 = shalt.err (!%p3986_p4)
}
0x13f4   :  { %s4009_s26 = smov 128  }
0x13f5   :  { %3159 = dma.vmem_to_hbm [thread:$0]  %s3154_s19, 256, %s4750_s18, [#allocation3], %s4009_s26, %s4009_s26, %s4005_s1  }
0x13f6   :  { %3998 = dma.done.wait [#allocation3], 256  }
0x13f7   :  { %3999 = vsyncadd [#allocation3], 4294967040 }
0x13f8   :  { %3163 = vsyncpa [#allocation3], 1 }

</bundles_post_ra>
